<compile_context>
chip_gen: v5e
topology: v5e:2x2
jax: 0.10.0
libtpu: 0.0.40
codegen_flags: <defaults>
</compile_context>

<pallas_src>
import numpy as np
import jax
import jax.numpy as jnp
from jax.experimental import pallas as pl
from jax.experimental.pallas import tpu as pltpu

ALPHA = 0.2        # LeakyReLU negative slope (plain Python float; module-level
                   # jnp constants would be captured by the kernel trace).
NEG_EDGE = -1e9    # module's non-edge mask value
NEG_PAD = -1e30    # kills padded rows in the column softmax


def gat_kernel(coef_ref, rowdata_ref, coldata_ref, adj_ref, out_ref):
    """One grid step = one column block of the (N_pad, N_pad) attention matrix.

    coef_ref    : SMEM (H,)      w_h * (alpha - 1)
    rowdata_ref : (N_pad, H + 2) [s_src per head | sum_h w_h*s_src | mask value
                                  per row: -1e9 real rows / -1e30 pad rows]
    coldata_ref : (H + 1, TN)    [s_dst per head | sum_h w_h*s_dst], this block
    adj_ref     : (N_pad, TN)    int8 binary adjacency block
    out_ref     : (N_pad, TN)    softmax(dim=0) attention block
    """
    H = coef_ref.shape[0]

    # Linear part of the head mix: sum_h w_h * (s_src_i + s_dst_j) as a single
    # broadcast-add of wrapper-precomputed weighted sums.
    mt = rowdata_ref[:, H:H + 1] + coldata_ref[H:H + 1, :]            # (N_pad, TN)

    # LeakyReLU(a) = a + (alpha-1)*min(a, 0); the linear term is already in mt.
    for h in range(H):                                                # static unroll
        att = rowdata_ref[:, h:h + 1] + coldata_ref[h:h + 1, :]
        mt = mt + coef_ref[h] * jnp.minimum(att, 0.0)

    # Mask straight from the int8 adjacency; false branch carries -1e9 for real
    # non-edge rows and -1e30 for padded rows (no separate pad-bias add).
    vals = jnp.where(adj_ref[...] != 0, mt, rowdata_ref[:, H + 1:H + 2])

    # Softmax over dim 0 — column-local, safe under column tiling.
    m = jnp.max(vals, axis=0, keepdims=True)
    e = jnp.exp(vals - m)
    denom = jnp.sum(e, axis=0, keepdims=True)
    inv = pl.reciprocal(denom, approx=True)
    inv = inv * (2.0 - denom * inv)          # one Newton step on the (1, TN) row
    out_ref[...] = e * inv


def _round_up(v, m):
    return (v + m - 1) // m * m


_VMEM_BUDGET = 32 * 1024 * 1024   # per-step working-set budget (fits v7x 64 MiB)
_VMEM_LIMIT = 48 * 1024 * 1024    # scoped-VMEM limit handed to Mosaic


def _pick_tn(n_pad):
    """Column tile: largest 128-multiple that divides n_pad, keeps the per-step
    working set under budget, and leaves >= 2 grid steps (>= 4 preferred) so a
    'parallel' column axis actually feeds both v7x TensorCores.

    Footprint ~ 2 dbl-buffered buffers x (4B out + 1B adj) + ~4 live f32
    temporaries (mt/att/vals/e) = ~26 B per (row, col) element.
    """
    per_col = 26 * n_pad
    for min_steps in (4, 2):
        for tn in (512, 256, 128):
            if (n_pad % tn == 0 and n_pad // tn >= min_steps
                    and per_col * tn <= _VMEM_BUDGET):
                return tn
    return 128


@jax.jit
def gat_forward(x_flat, W, a1, a2, adj_i8, lin_w, lin_b):
    """x_flat: (N, S) f32; W: (H, S, D); a1/a2: (H, D); adj_i8: (N, N) int8
    binary adjacency; lin_w: (1, H); lin_b: (1,). Returns (N, N) attention."""
    N, S = x_flat.shape
    H = W.shape[0]

    # Fold each head's projection + attention vector (W_h a1_h | W_h a2_h) and
    # run the projection ONCE here (grid-invariant; hoisted out of the kernel).
    c1 = jnp.einsum('hsd,hd->sh', W, a1).astype(jnp.float32)          # (S, H)
    c2 = jnp.einsum('hsd,hd->sh', W, a2).astype(jnp.float32)          # (S, H)
    s_src = (x_flat @ c1).astype(jnp.float32)                         # (N, H)
    s_dst = (x_flat @ c2).astype(jnp.float32)                         # (N, H)

    lw = lin_w.reshape(H).astype(jnp.float32)
    lin_src = s_src @ lw                                              # (N,)
    lin_dst = s_dst @ lw                                              # (N,)
    coef = (lw * (ALPHA - 1.0)).astype(jnp.float32)                   # (H,)
    # TODO(synk): the Linear(head_n, 1) bias shifts every edge entry of a
    # column by the same constant, which softmax(dim=0) cancels exactly, so it
    # is folded away (lin_b unused, kept for interface parity).
    del lin_b

    # Pad node count to a lane-dense multiple of 128 (>= 256 so the column grid
    # always has >= 2 steps).
    n_pad = max(256, _round_up(N, 128))
    tn = _pick_tn(n_pad)
    grid = (n_pad // tn,)

    row_neg = jnp.where(jnp.arange(n_pad) < N, NEG_EDGE, NEG_PAD)
    rowdata = jnp.zeros((n_pad, H + 2), jnp.float32)
    rowdata = rowdata.at[:N, :H].set(s_src)
    rowdata = rowdata.at[:N, H].set(lin_src)
    rowdata = rowdata.at[:, H + 1].set(row_neg.astype(jnp.float32))

    coldata = jnp.zeros((H + 1, n_pad), jnp.float32)
    coldata = coldata.at[:H, :N].set(s_dst.T)
    coldata = coldata.at[H, :N].set(lin_dst)

    adj_p = jnp.zeros((n_pad, n_pad), jnp.int8).at[:N, :N].set(adj_i8)

    out_p = pl.pallas_call(
        gat_kernel,
        out_shape=jax.ShapeDtypeStruct((n_pad, n_pad), jnp.float32),
        grid=grid,
        in_specs=[
            pl.BlockSpec(memory_space=pltpu.MemorySpace.SMEM),        # coef (H,)
            pl.BlockSpec((n_pad, H + 2), lambda j: (0, 0)),           # rowdata (resident)
            pl.BlockSpec((H + 1, tn), lambda j: (0, j)),              # coldata block
            pl.BlockSpec((n_pad, tn), lambda j: (0, j)),              # int8 adjacency block
        ],
        out_specs=pl.BlockSpec((n_pad, tn), lambda j: (0, j)),
        compiler_params=pltpu.CompilerParams(
            dimension_semantics=("parallel",),    # v7x: split columns over both TCs
            vmem_limit_bytes=_VMEM_LIMIT),
    )(coef, rowdata, coldata, adj_p)

    return out_p[:N, :N]


if __name__ == "__main__":
    # Small shapes consistent with the module: x is (b, n, s), N = b*n nodes.
    b, n = 3, 50
    S = 32          # input_dim
    D = 16          # out_dim
    H = 4           # head_n
    N = b * n       # 150 -> padded to 256, column tile 128, grid=(2,)

    keys = iter(jax.random.split(jax.random.PRNGKey(0), 8))

    x = jax.random.normal(next(keys), (b, n, S), jnp.float32)

    # heads_dict[n, 0]: xavier_normal_ gain=1.414 on (S, D)
    std_w = 1.414 * np.sqrt(2.0 / (S + D))
    W = std_w * jax.random.normal(next(keys), (H, S, D), jnp.float32)

    # heads_dict[n, 1]: xavier_normal_ gain=1.414 on (1, 2D)
    std_a = 1.414 * np.sqrt(2.0 / (1 + 2 * D))
    a_full = std_a * jax.random.normal(next(keys), (H, 2 * D), jnp.float32)
    a1, a2 = a_full[:, :D], a_full[:, D:]

    # nn.Linear(head_n, 1) params
    lim = 1.0 / np.sqrt(H)
    lin_w = jax.random.uniform(next(keys), (1, H), jnp.float32, -lim, lim)
    lin_b = jax.random.uniform(next(keys), (1,), jnp.float32, -lim, lim)

    # Binary adjacency (a_sparse values == 1.0); force one zero-edge column to
    # exercise the uniform-softmax corner case under row padding.
    adj = (jax.random.uniform(next(keys), (N, N)) < 0.15).astype(jnp.float32)
    adj = adj.at[:, 5].set(0.0)
    adj_i8 = adj.astype(jnp.int8)

    x_flat = x.reshape(N, S)
    out = jax.block_until_ready(
        gat_forward(x_flat, W, a1, a2, adj_i8, lin_w, lin_b))

    # Pure-JAX reference of the module's math (dense reformulation of the
    # edge gather/scatter for a duplicate-free binary adjacency), incl. bias.
    mask = jnp.where(adj == 0.0, jnp.float32(-1e9), jnp.float32(0.0))

    def ref(xf):
        mt = jnp.zeros((N, N), jnp.float32)
        for h in range(H):
            hf = xf @ W[h]
            s1 = hf @ a1[h]
            s2 = hf @ a2[h]
            att = s1[:, None] + s2[None, :]
            att = jnp.where(att > 0, att, ALPHA * att)
            mt = mt + att * lin_w[0, h]
        mt = mt + lin_b[0]
        vals = adj * mt + mask
        return jax.nn.softmax(vals, axis=0)

    np.testing.assert_allclose(np.asarray(out), np.asarray(ref(x_flat)),
                               rtol=2e-3, atol=2e-3)
    print("KERNEL_OK")
</pallas_src>

<mosaic_0001>
module attributes {stable_mosaic.version = 11 : i64} {
  func.func @gat_kernel(%arg0: i32, %arg1: memref<4xf32, #tpu.memory_space<smem>>, %arg2: memref<256x6xf32, #tpu.memory_space<vmem>>, %arg3: memref<5x128xf32, #tpu.memory_space<vmem>>, %arg4: memref<256x128xi8, #tpu.memory_space<vmem>>, %arg5: memref<256x128xf32, #tpu.memory_space<vmem>>) attributes {dimension_semantics = [#tpu.dimension_semantics<parallel>], iteration_bounds = array<i64: 2>, scalar_prefetch = 0 : i64, scratch_operands = 0 : i64, tpu.core_type = #tpu.core_type<tc>, window_params = [{transform_indices = @transform_0, window_bounds = array<i64: 4>}, {pipeline_mode = #tpu.pipeline_mode<synchronous>, transform_indices = @transform_1, window_bounds = array<i64: 256, 6>}, {transform_indices = @transform_2, window_bounds = array<i64: 5, 128>}, {transform_indices = @transform_3, window_bounds = array<i64: 256, 128>}, {transform_indices = @transform_4, window_bounds = array<i64: 256, 128>}]} {
    %c0 = arith.constant 0 : index
    %c4 = arith.constant 4 : index
    %0 = vector.load %arg2[%c0, %c4] : memref<256x6xf32, #tpu.memory_space<vmem>>, vector<256x1xf32>
    %c4_0 = arith.constant 4 : index
    %c0_1 = arith.constant 0 : index
    %1 = vector.load %arg3[%c4_0, %c0_1] : memref<5x128xf32, #tpu.memory_space<vmem>>, vector<1x128xf32>
    %2 = vector.broadcast %0 : vector<256x1xf32> to vector<256x128xf32>
    %3 = vector.broadcast %1 : vector<1x128xf32> to vector<256x128xf32>
    %4 = arith.addf %2, %3 : vector<256x128xf32>
    %c0_2 = arith.constant 0 : index
    %c0_3 = arith.constant 0 : index
    %5 = vector.load %arg2[%c0_2, %c0_3] : memref<256x6xf32, #tpu.memory_space<vmem>>, vector<256x1xf32>
    %c0_4 = arith.constant 0 : index
    %c0_5 = arith.constant 0 : index
    %6 = vector.load %arg3[%c0_4, %c0_5] : memref<5x128xf32, #tpu.memory_space<vmem>>, vector<1x128xf32>
    %7 = vector.broadcast %5 : vector<256x1xf32> to vector<256x128xf32>
    %8 = vector.broadcast %6 : vector<1x128xf32> to vector<256x128xf32>
    %9 = arith.addf %7, %8 : vector<256x128xf32>
    %c0_6 = arith.constant 0 : index
    %10 = memref.load %arg1[%c0_6] : memref<4xf32, #tpu.memory_space<smem>>
    %cst = arith.constant 0.000000e+00 : f32
    %11 = vector.broadcast %cst : f32 to vector<256x128xf32>
    %12 = arith.minimumf %9, %11 : vector<256x128xf32>
    %13 = vector.broadcast %10 : f32 to vector<256x128xf32>
    %14 = arith.mulf %13, %12 : vector<256x128xf32>
    %15 = arith.addf %4, %14 : vector<256x128xf32>
    %c0_7 = arith.constant 0 : index
    %c1 = arith.constant 1 : index
    %16 = vector.load %arg2[%c0_7, %c1] : memref<256x6xf32, #tpu.memory_space<vmem>>, vector<256x1xf32>
    %c1_8 = arith.constant 1 : index
    %c0_9 = arith.constant 0 : index
    %17 = vector.load %arg3[%c1_8, %c0_9] : memref<5x128xf32, #tpu.memory_space<vmem>>, vector<1x128xf32>
    %18 = vector.broadcast %16 : vector<256x1xf32> to vector<256x128xf32>
    %19 = vector.broadcast %17 : vector<1x128xf32> to vector<256x128xf32>
    %20 = arith.addf %18, %19 : vector<256x128xf32>
    %c1_10 = arith.constant 1 : index
    %21 = memref.load %arg1[%c1_10] : memref<4xf32, #tpu.memory_space<smem>>
    %cst_11 = arith.constant 0.000000e+00 : f32
    %22 = vector.broadcast %cst_11 : f32 to vector<256x128xf32>
    %23 = arith.minimumf %20, %22 : vector<256x128xf32>
    %24 = vector.broadcast %21 : f32 to vector<256x128xf32>
    %25 = arith.mulf %24, %23 : vector<256x128xf32>
    %26 = arith.addf %15, %25 : vector<256x128xf32>
    %c0_12 = arith.constant 0 : index
    %c2 = arith.constant 2 : index
    %27 = vector.load %arg2[%c0_12, %c2] : memref<256x6xf32, #tpu.memory_space<vmem>>, vector<256x1xf32>
    %c2_13 = arith.constant 2 : index
    %c0_14 = arith.constant 0 : index
    %28 = vector.load %arg3[%c2_13, %c0_14] : memref<5x128xf32, #tpu.memory_space<vmem>>, vector<1x128xf32>
    %29 = vector.broadcast %27 : vector<256x1xf32> to vector<256x128xf32>
    %30 = vector.broadcast %28 : vector<1x128xf32> to vector<256x128xf32>
    %31 = arith.addf %29, %30 : vector<256x128xf32>
    %c2_15 = arith.constant 2 : index
    %32 = memref.load %arg1[%c2_15] : memref<4xf32, #tpu.memory_space<smem>>
    %cst_16 = arith.constant 0.000000e+00 : f32
    %33 = vector.broadcast %cst_16 : f32 to vector<256x128xf32>
    %34 = arith.minimumf %31, %33 : vector<256x128xf32>
    %35 = vector.broadcast %32 : f32 to vector<256x128xf32>
    %36 = arith.mulf %35, %34 : vector<256x128xf32>
    %37 = arith.addf %26, %36 : vector<256x128xf32>
    %c0_17 = arith.constant 0 : index
    %c3 = arith.constant 3 : index
    %38 = vector.load %arg2[%c0_17, %c3] : memref<256x6xf32, #tpu.memory_space<vmem>>, vector<256x1xf32>
    %c3_18 = arith.constant 3 : index
    %c0_19 = arith.constant 0 : index
    %39 = vector.load %arg3[%c3_18, %c0_19] : memref<5x128xf32, #tpu.memory_space<vmem>>, vector<1x128xf32>
    %40 = vector.broadcast %38 : vector<256x1xf32> to vector<256x128xf32>
    %41 = vector.broadcast %39 : vector<1x128xf32> to vector<256x128xf32>
    %42 = arith.addf %40, %41 : vector<256x128xf32>
    %c3_20 = arith.constant 3 : index
    %43 = memref.load %arg1[%c3_20] : memref<4xf32, #tpu.memory_space<smem>>
    %cst_21 = arith.constant 0.000000e+00 : f32
    %44 = vector.broadcast %cst_21 : f32 to vector<256x128xf32>
    %45 = arith.minimumf %42, %44 : vector<256x128xf32>
    %46 = vector.broadcast %43 : f32 to vector<256x128xf32>
    %47 = arith.mulf %46, %45 : vector<256x128xf32>
    %48 = arith.addf %37, %47 : vector<256x128xf32>
    %c0_22 = arith.constant 0 : index
    %c0_23 = arith.constant 0 : index
    %49 = vector.load %arg4[%c0_22, %c0_23] : memref<256x128xi8, #tpu.memory_space<vmem>>, vector<256x128xi8>
    %c0_i8 = arith.constant 0 : i8
    %50 = vector.broadcast %c0_i8 : i8 to vector<256x128xi8>
    %51 = arith.cmpi ne, %49, %50 : vector<256x128xi8>
    %c0_24 = arith.constant 0 : index
    %c5 = arith.constant 5 : index
    %52 = vector.load %arg2[%c0_24, %c5] : memref<256x6xf32, #tpu.memory_space<vmem>>, vector<256x1xf32>
    %53 = vector.shape_cast %52 : vector<256x1xf32> to vector<256x1xf32>
    %54 = vector.broadcast %53 : vector<256x1xf32> to vector<256x128xf32>
    %55 = arith.select %51, %48, %54 : vector<256x128xi1>, vector<256x128xf32>
    %cst_25 = arith.constant dense<0xFF800000> : vector<128xf32>
    %56 = vector.multi_reduction <maximumf>, %55, %cst_25 [0] : vector<256x128xf32> to vector<128xf32>
    %57 = vector.shape_cast %56 : vector<128xf32> to vector<1x128xf32>
    %58 = vector.broadcast %57 : vector<1x128xf32> to vector<256x128xf32>
    %59 = arith.subf %55, %58 : vector<256x128xf32>
    %60 = math.exp %59 : vector<256x128xf32>
    %cst_26 = arith.constant dense<0.000000e+00> : vector<128xf32>
    %61 = vector.multi_reduction <add>, %60, %cst_26 [0] : vector<256x128xf32> to vector<128xf32>
    %62 = vector.shape_cast %61 : vector<128xf32> to vector<1x128xf32>
    %63 = tpu.reciprocal %62 {approx = true} : vector<1x128xf32> -> vector<1x128xf32>
    %64 = arith.mulf %62, %63 : vector<1x128xf32>
    %cst_27 = arith.constant 2.000000e+00 : f32
    %65 = vector.broadcast %cst_27 : f32 to vector<1x128xf32>
    %66 = arith.subf %65, %64 : vector<1x128xf32>
    %67 = arith.mulf %63, %66 : vector<1x128xf32>
    %68 = vector.broadcast %67 : vector<1x128xf32> to vector<256x128xf32>
    %69 = arith.mulf %60, %68 : vector<256x128xf32>
    %c0_28 = arith.constant 0 : index
    %c0_29 = arith.constant 0 : index
    %70 = vector.load %arg5[%c0_28, %c0_29] : memref<256x128xf32, #tpu.memory_space<vmem>>, vector<256x128xf32>
    tpu.vector_store %arg5[%c0_28, %c0_29], %69 {strides = array<i32>} : memref<256x128xf32, #tpu.memory_space<vmem>>, vector<256x128xf32>,
    return
  }
  func.func @transform_0(%arg0: i32) -> i32 {
    %c0_i32 = arith.constant 0 : i32
    %c0_i32_0 = arith.constant 0 : i32
    return %c0_i32 : i32
  }
  func.func @transform_1(%arg0: i32) -> (i32, i32) {
    %c0_i32 = arith.constant 0 : i32
    %c0_i32_0 = arith.constant 0 : i32
    %c0_i32_1 = arith.constant 0 : i32
    return %c0_i32, %c0_i32_0 : i32, i32
  }
  func.func @transform_2(%arg0: i32) -> (i32, i32) {
    %c0_i32 = arith.constant 0 : i32
    %c0_i32_0 = arith.constant 0 : i32
    return %c0_i32, %arg0 : i32, i32
  }
  func.func @transform_3(%arg0: i32) -> (i32, i32) {
    %c0_i32 = arith.constant 0 : i32
    %c0_i32_0 = arith.constant 0 : i32
    return %c0_i32, %arg0 : i32, i32
  }
  func.func @transform_4(%arg0: i32) -> (i32, i32) {
    %c0_i32 = arith.constant 0 : i32
    %c0_i32_0 = arith.constant 0 : i32
    return %c0_i32, %arg0 : i32, i32
  }
}

</mosaic_0001>

<bundles_post_ra>
// kernel: gat_forward.1
= control target key start
LH: loop header
LB: loop body
LE: loop exit
PB: predicated region body
PF: predicated region fallthrough
CT: control target
= control target key end

     0   :  { %9 = vsyncpa [#allocation3], 0  ;;  %s2702_s15 = smov 0   ;;  %s2704_s16 = smov 0   ;;  %s4670_s0 = inlined_call_operand.vmem [shape: f32[4], index: 0, kind: input, shape index: {}]   ;;  %s4671_s1 = inlined_call_operand.vmem [shape: f32[256,6], index: 1, kind: input, shape index: {}]   ;;  %s4672_s2 = inlined_call_operand.vmem [shape: f32[5,256], index: 2, kind: input, shape index: {}]   ;;  %s4673_s3 = inlined_call_operand.vmem [shape: s8[256,256], index: 3, kind: input, shape index: {}]   ;;  %s4674_s4 = inlined_call_operand.vmem [shape: f32[256,256], index: 4, kind: output, shape index: {}]  }
   0x1   :  { %s2706_s17 = smov 0  }
   0x2 LB: > { %s2718_s18 = sadd.s32 4294967295, %s2668_s17   ;;  %s2721_s19 = sadd.s32 1, %s2668_s17   ;;  %s2668_s17 = sphi %s2706_s17, %s4839_s17   ;;  %s2664_s16 = sphi %s2704_s16, %s4838_s16   ;;  %s2660_s15 = sphi %s2702_s15, %s4837_s15  }
   0x3   : > { %s87_s20 = ssub.s32 %s2668_s17, %s2721_s19  ;;  %s90_s21 = sadd.s32 1, %s2664_s16 }
   0x4   : > { %p88_p0 = scmp.eq.s32.totalorder %s87_s20, 0  ;;  %p97_p1 = scmp.ne.s32.totalorder %s2664_s16, %s2660_s15 }
   0x5   : > { %p98_p2 = scmp.eq.s32.totalorder %s2668_s17, 0  ;;  %p127_p3 = scmp.eq.s32.totalorder %s2718_s18, 1 }
   0x6   : > { %s2731_s22 = scalar_select %p88_p0, %s2664_s16, %s90_s21  }
   0x7   : > { %p2733_p4 = por %p98_p2, %p97_p1  ;;  %p2737_p5 = por %p127_p3, %p97_p1 }
   0x8   : > { %p2448_p6 = scmp.ge.s32.totalorder %s2668_s17, 1  ;;  %p140_p7 = scmp.lt.s32.totalorder %s2668_s17, 3 }
   0x9   : > { %p2473_p8 = scmp.eq.s32.totalorder %s2718_s18, 0  ;;  %s152_s28 = sshll.u32 %s4670_s0, 4  ;;  %s153_s28 = int_to_ptr.vmem [resolvable:$true] %s152_s28 }
   0xa   : > { %p2744_p9 = pnand %p2448_p6, %p140_p7  ;;  %s2670_s29 = smov [#allocation2]  }
   0xb   : > { %p2450_p12 = scmp.ge.s32.totalorder %s2668_s17, 2 }
   0xc   : > { %p2469_p10 = pneg %p2744_p9 }
   0xd   : > { %162 = sbr.rel (%p2450_p12) target bundleno = 30 (0x1e), region = 24 }
   0xe   : > { %p2470_p11 = pnand %p2473_p8, %p2469_p10 }
  0x10   : > { %2472 = dma.vmem_to_smem (!%p2470_p11), %s153_s28, 16, %s2670_s29, [#allocation3]  }
  0x12   : > { %172 = sbr.rel (!%p2733_p4) target bundleno = 30 (0x1e), region = 32  ;;  %s174_s30 = sand.u32 (%p2733_p4), 1, %s2664_s16  }
  0x13   : > { %s2452_s5 = sshll.u32 (%p2733_p4), %s2668_s17, 3  ;;  %s2451_s6 = sshll.u32 (%p2733_p4), %s174_s30, 6 }
  0x14   : > { %s178_s9 = scalar_lea.vmem (%p2733_p4), %s4673_s3, %s2452_s5  ;;  %s176_s10 = scalar_lea.vmem (%p2733_p4), [#allocation4], %s2451_s6 }
  0x15   : > { %v221_v0 = vld [vmem:[%s178_s9] sm:$0xff] (%p2733_p4)  ;;  %v223_v1 = vld [vmem:[%s178_s9 + $0x10] sm:$0xff] (%p2733_p4) }
  0x16   : > { %v225_v2 = vld [vmem:[%s178_s9 + $0x20] sm:$0xff] (%p2733_p4)  ;;  %222 = vst [vmem:[%s176_s10] sm:$0xff] (%p2733_p4), %v221_v0  ;;  %v227_v3 = vld [vmem:[%s178_s9 + $0x30] sm:$0xff] (%p2733_p4) }
  0x17   : > { %224 = vst [vmem:[%s176_s10 + $0x8] sm:$0xff] %v223_v1  ;;  %v229_v4 = vld [vmem:[%s178_s9 + $0x40] sm:$0xff]  ;;  %v231_v5 = vld [vmem:[%s178_s9 + $0x50] sm:$0xff] }
  0x18   : > { %226 = vst [vmem:[%s176_s10 + $0x10] sm:$0xff] %v225_v2  ;;  %v233_v6 = vld [vmem:[%s178_s9 + $0x60] sm:$0xff]  ;;  %v235_v7 = vld [vmem:[%s178_s9 + $0x70] sm:$0xff] }
  0x19   : > { %228 = vst [vmem:[%s176_s10 + $0x18] sm:$0xff] %v227_v3 }
  0x1a   : > { %230 = vst [vmem:[%s176_s10 + $0x20] sm:$0xff] %v229_v4 }
  0x1b   : > { %232 = vst [vmem:[%s176_s10 + $0x28] sm:$0xff] %v231_v5 }
  0x1c   : > { %234 = vst [vmem:[%s176_s10 + $0x30] sm:$0xff] %v233_v6 }
  0x1d   : > { %236 = vst [vmem:[%s176_s10 + $0x38] sm:$0xff] %v235_v7 }
  0x1e PF: > { %245 = sbr.rel (%p2744_p9) target bundleno = 873 (0x369), region = 70 }
  0x23   : > { %2655 = dma.done.wait (%p2473_p8), [#allocation3], 16  }
  0x24   : > { %2657 = vsyncadd (%p2473_p8), [#allocation3], 4294967280  ;;  %s253_s11 = sand.u32 1, %s2660_s15  }
  0x25   : > { %s2455_s12 = sshll.u32 %s253_s11, 6 }
  0x26   : > { %s2772_s13 = scalar_lea.vmem [#allocation4], %s2455_s12 }
  0x27   : > { %259 = sfence }
  0x28   : > { %v2777_v8 = vld [vmem:[%s4671_s1 + $0x20] sm:$0xff]  ;;  %v2782_v9 = vld [vmem:[%s4671_s1 + $0x10] sm:$0xff]  ;;  %p282_p13 = scmp.lt.s32.totalorder %s2718_s18, 1  ;;  %v2671_v11 = vmov 4   ;;  %v2802_v12 = vld [vmem:[%s4671_s1 + $0x28] sm:$0xff]  ;;  %v4675_v41 = vmov 0  }
  0x29   : > { %4699 = vst [vmem:[#allocation7_spill] sm:$0xff] %v2777_v8  ;;  %v2787_v10 = vld [vmem:[%s4671_s1] sm:$0xff]  ;;  %2508 = vset.pattern.permute.xlu2 %v2671_v11  ;;  %2507 = vset.pattern.permute.xlu1 %v2671_v11  ;;  %v2807_v13 = vld [vmem:[%s4671_s1 + $0x18] sm:$0xff]  ;;  %v2812_v14 = vld [vmem:[%s4671_s1 + $0x8] sm:$0xff]  ;;  %v2673_v2 = vmov 1   ;;  %s676_s14 = sld [smem:[#allocation2]] }
  0x2a   : > { %4700 = vst [vmem:[#allocation8_spill] sm:$0xff] %v2782_v9  ;;  %2506 = vset.pattern.permute.xlu0 %v2671_v11  ;;  %343 = vperm.xlu2 %2508, %v2777_v8   ;;  %s283_s26 = scalar_select %p282_p13, %s2718_s18, 1  ;;  %v2820_v15 = vld [vmem:[%s4671_s1 + $0x40] sm:$0xff]  ;;  %v2825_v16 = vld [vmem:[%s4671_s1 + $0x38] sm:$0xff]  ;;  %v2830_v17 = vld [vmem:[%s4671_s1 + $0x30] sm:$0xff] }
  0x2b   : > { %4701 = vst [vmem:[#allocation9_spill] sm:$0xff] %v2787_v10  ;;  %333 = vperm.xlu1 %2507, %v2782_v9   ;;  %323 = vperm.xlu0 %2506, %v2787_v10   ;;  %v2838_v18 = vld [vmem:[%s4671_s1 + $0x58] sm:$0xff]  ;;  %v2843_v19 = vld [vmem:[%s4671_s1 + $0x50] sm:$0xff]  ;;  %v2848_v20 = vld [vmem:[%s4671_s1 + $0x48] sm:$0xff]  ;;  %s2458_s17 = sld [smem:[#allocation2 + $0x1]] }
  0x2c   : > { %s2457_s27 = sshll.u32 %s283_s26, 3  ;;  %4702 = vst [vmem:[#allocation10_spill] sm:$0xff] %v2802_v12  ;;  %v2856_v21 = vld [vmem:[%s4671_s1 + $0x70] sm:$0xff]  ;;  %v2861_v22 = vld [vmem:[%s4671_s1 + $0x68] sm:$0xff]  ;;  %v2866_v23 = vld [vmem:[%s4671_s1 + $0x60] sm:$0xff]  ;;  %s3354_s20 = sld [smem:[#allocation2 + $0x2]] }
  0x2d   : > { %s2797_s30 = scalar_lea.vmem %s4672_s2, %s2457_s27  ;;  %4703 = vst [vmem:[#allocation11_spill] sm:$0xff] %v2807_v13  ;;  %v2874_v24 = vld [vmem:[%s4671_s1 + $0x88] sm:$0xff]  ;;  %v2879_v25 = vld [vmem:[%s4671_s1 + $0x80] sm:$0xff]  ;;  %v2884_v26 = vld [vmem:[%s4671_s1 + $0x78] sm:$0xff]  ;;  %s2460_s6 = sld [smem:[#allocation2 + $0x3]] }
  0x2e   : > { %4704 = vst [vmem:[#allocation12_spill] sm:$0xff] %v2820_v15  ;;  %v2892_v27 = vld [vmem:[%s4671_s1 + $0xa0] sm:$0xff]  ;;  %v2897_v28 = vld [vmem:[%s4671_s1 + $0x98] sm:$0xff]  ;;  %v2902_v29 = vld [vmem:[%s4671_s1 + $0x90] sm:$0xff] }
  0x2f   : > { %4705 = vst [vmem:[#allocation13_spill] sm:$0xff] %v2825_v16  ;;  %v2910_v30 = vld [vmem:[%s4671_s1 + $0xb8] sm:$0xff]  ;;  %v2915_v31 = vld [vmem:[%s4671_s1 + $0xb0] sm:$0xff]  ;;  %v2920_v32 = vld [vmem:[%s4671_s1 + $0xa8] sm:$0xff] }
  0x30   : > { %4706 = vst [vmem:[#allocation14_spill] sm:$0xff] %v2848_v20  ;;  %v2928_v33 = vld [vmem:[%s4671_s1 + $0xd0] sm:$0xff]  ;;  %v2933_v34 = vld [vmem:[%s4671_s1 + $0xc8] sm:$0xff]  ;;  %v2938_v35 = vld [vmem:[%s4671_s1 + $0xc0] sm:$0xff] }
  0x31   : > { %4707 = vst [vmem:[#allocation15_spill] sm:$0xff] %v2866_v23  ;;  %v2946_v36 = vld [vmem:[%s4671_s1 + $0xe8] sm:$0xff]  ;;  %v2951_v37 = vld [vmem:[%s4671_s1 + $0xe0] sm:$0xff]  ;;  %v2956_v38 = vld [vmem:[%s4671_s1 + $0xd8] sm:$0xff] }
  0x32   : > { %348 = vperm.xlu2 %2508, %v2802_v12   ;;  %4708 = vst [vmem:[#allocation16_spill] sm:$0xff] %v2884_v26  ;;  %v2964_v39 = vld [vmem:[%s4671_s1 + $0xf8] sm:$0xff]  ;;  %v2969_v40 = vld [vmem:[%s4671_s1 + $0xf0] sm:$0xff] }
  0x33   : > { %338 = vperm.xlu1 %2507, %v2807_v13   ;;  %328 = vperm.xlu0 %2506, %v2812_v14   ;;  %4709 = vst [vmem:[#allocation17_spill] sm:$0xff] %v2902_v29 }
  0x34   : > { %4710 = vst [vmem:[#allocation18_spill] sm:$0xff] %v2964_v39 }
  0x3a   : > { %363 = vperm.xlu2 %2508, %v2820_v15  }
  0x3b   : > { %358 = vperm.xlu1 %2507, %v2825_v16   ;;  %353 = vperm.xlu0 %2506, %v2830_v17  }
  0x42   : > { %378 = vperm.xlu2 %2508, %v2838_v18  }
  0x43   : > { %373 = vperm.xlu1 %2507, %v2843_v19   ;;  %368 = vperm.xlu0 %2506, %v2848_v20  }
  0x4a   : > { %393 = vperm.xlu2 %2508, %v2856_v21  }
  0x4b   : > { %388 = vperm.xlu1 %2507, %v2861_v22   ;;  %383 = vperm.xlu0 %2506, %v2866_v23  }
  0x52   : > { %408 = vperm.xlu2 %2508, %v2874_v24  }
  0x53   : > { %403 = vperm.xlu1 %2507, %v2879_v25   ;;  %398 = vperm.xlu0 %2506, %v2884_v26  }
  0x5a   : > { %423 = vperm.xlu2 %2508, %v2892_v27  }
  0x5b   : > { %418 = vperm.xlu1 %2507, %v2897_v28   ;;  %413 = vperm.xlu0 %2506, %v2902_v29  }
  0x62   : > { %438 = vperm.xlu2 %2508, %v2910_v30  }
  0x63   : > { %433 = vperm.xlu1 %2507, %v2915_v31   ;;  %428 = vperm.xlu0 %2506, %v2920_v32  }
  0x6a   : > { %453 = vperm.xlu2 %2508, %v2928_v33  }
  0x6b   : > { %448 = vperm.xlu1 %2507, %v2933_v34   ;;  %443 = vperm.xlu0 %2506, %v2938_v35  }
  0x72   : > { %468 = vperm.xlu2 %2508, %v2946_v36  }
  0x73   : > { %463 = vperm.xlu1 %2507, %v2951_v37   ;;  %458 = vperm.xlu0 %2506, %v2956_v38  }
  0x7a   : > { %2509 = vset.pattern.permute.xlu2 %v4675_v41 }
  0x7b   : > { %478 = vperm.xlu1 %2507, %v2964_v39   ;;  %473 = vperm.xlu0 %2506, %v2969_v40  }
  0x7c   : > { %516 = vperm.xlu2 %2509, %v2787_v10  }
  0x83   : > { %2511 = vset.pattern.permute.xlu1 %v4675_v41  ;;  %2510 = vset.pattern.permute.xlu0 %v4675_v41 }
  0x84   : > { %524 = vperm.xlu1 %2511, %v2782_v9   ;;  %528 = vperm.xlu2 %2509, %v2807_v13   ;;  %v2979_v42 = vpop.permute.xlu2 %343 }
  0x85   : > { %4711 = vst [vmem:[#allocation19_spill] sm:$0xff] %v2979_v42  ;;  %520 = vperm.xlu0 %2510, %v2812_v14  }
  0x8c   : > { %532 = vperm.xlu1 %2511, %v2777_v8   ;;  %536 = vperm.xlu2 %2509, %v2802_v12   ;;  %v2984_v43 = vpop.permute.xlu2 %348 }
  0x8d   : > { %4712 = vst [vmem:[#allocation20_spill] sm:$0xff] %v2984_v43  ;;  %540 = vperm.xlu0 %2510, %v2830_v17  }
  0x94   : > { %544 = vperm.xlu1 %2511, %v2825_v16   ;;  %548 = vperm.xlu2 %2509, %v2820_v15   ;;  %v2989_v44 = vpop.permute.xlu2 %363 }
  0x95   : > { %4713 = vst [vmem:[#allocation21_spill] sm:$0xff] %v2989_v44  ;;  %552 = vperm.xlu0 %2510, %v2848_v20  }
  0x9c   : > { %556 = vperm.xlu1 %2511, %v2843_v19   ;;  %560 = vperm.xlu2 %2509, %v2838_v18   ;;  %v2994_v45 = vpop.permute.xlu2 %378 }
  0x9d   : > { %4714 = vst [vmem:[#allocation22_spill] sm:$0xff] %v2994_v45  ;;  %564 = vperm.xlu0 %2510, %v2866_v23   ;;  %v2997_v46 = vpop.permute.xlu1 %333  ;;  %v2999_v47 = vpop.permute.xlu0 %323 }
  0x9e   : > { %4715 = vst [vmem:[#allocation23_spill] sm:$0xff] %v2997_v46 }
  0xa4   : > { %568 = vperm.xlu1 %2511, %v2861_v22   ;;  %572 = vperm.xlu2 %2509, %v2856_v21   ;;  %v3003_v48 = vpop.permute.xlu2 %393 }
  0xa5   : > { %4716 = vst [vmem:[#allocation24_spill] sm:$0xff] %v3003_v48  ;;  %576 = vperm.xlu0 %2510, %v2884_v26   ;;  %v3006_v49 = vpop.permute.xlu1 %338  ;;  %v3008_v50 = vpop.permute.xlu0 %328 }
  0xa6   : > { %4717 = vst [vmem:[#allocation25_spill] sm:$0xff] %v3006_v49 }
  0xa7   : > { %4718 = vst [vmem:[#allocation26_spill] sm:$0xff] %v3008_v50 }
  0xac   : > { %580 = vperm.xlu1 %2511, %v2879_v25   ;;  %584 = vperm.xlu2 %2509, %v2874_v24   ;;  %v3012_v51 = vpop.permute.xlu2 %408 }
  0xad   : > { %588 = vperm.xlu0 %2510, %v2902_v29   ;;  %v3015_v52 = vpop.permute.xlu1 %358  ;;  %v3017_v53 = vpop.permute.xlu0 %353 }
  0xae   : > { %4719 = vst [vmem:[#allocation27_spill] sm:$0xff] %v3015_v52 }
  0xb4   : > { %592 = vperm.xlu1 %2511, %v2897_v28   ;;  %596 = vperm.xlu2 %2509, %v2892_v27   ;;  %v3021_v54 = vpop.permute.xlu2 %423 }
  0xb5   : > { %600 = vperm.xlu0 %2510, %v2920_v32   ;;  %v3024_v55 = vpop.permute.xlu1 %373  ;;  %v3026_v56 = vpop.permute.xlu0 %368 }
  0xb6   : > { %4720 = vst [vmem:[#allocation28_spill] sm:$0xff] %v3024_v55 }
  0xbc   : > { %604 = vperm.xlu1 %2511, %v2915_v31   ;;  %608 = vperm.xlu2 %2509, %v2910_v30   ;;  %v3030_v57 = vpop.permute.xlu2 %438 }
  0xbd   : > { %612 = vperm.xlu0 %2510, %v2938_v35   ;;  %v3033_v58 = vpop.permute.xlu1 %388  ;;  %v3035_v59 = vpop.permute.xlu0 %383 }
  0xbe   : > { %4721 = vst [vmem:[#allocation29_spill] sm:$0xff] %v3033_v58 }
  0xc4   : > { %616 = vperm.xlu1 %2511, %v2933_v34   ;;  %620 = vperm.xlu2 %2509, %v2928_v33   ;;  %v3039_v60 = vpop.permute.xlu2 %453 }
  0xc5   : > { %624 = vperm.xlu0 %2510, %v2956_v38   ;;  %v3042_v61 = vpop.permute.xlu1 %403  ;;  %v3044_v62 = vpop.permute.xlu0 %398 }
  0xc6   : > { %4722 = vst [vmem:[#allocation30_spill] sm:$0xff] %v3042_v61 }
  0xcc   : > { %628 = vperm.xlu1 %2511, %v2951_v37   ;;  %632 = vperm.xlu2 %2509, %v2946_v36   ;;  %v3048_v63 = vpop.permute.xlu2 %468 }
  0xcd   : > { %636 = vperm.xlu0 %2510, %v2969_v40   ;;  %v3051_v0 = vpop.permute.xlu1 %418  ;;  %v3053_v1 = vpop.permute.xlu0 %413 }
  0xd4   : > { %640 = vperm.xlu1 %2511, %v2964_v39   ;;  %2512 = vset.pattern.permute.xlu2 %v2673_v2 }
  0xd5   : > { %2513 = vset.pattern.permute.xlu0 %v2673_v2  ;;  %v3056_v3 = vpop.permute.xlu1 %433  ;;  %776 = vperm.xlu2 %2512, %v2787_v10   ;;  %v3059_v4 = vpop.permute.xlu0 %428 }
  0xd6   : > { %4723 = vst [vmem:[#allocation31_spill] sm:$0xff] %v3056_v3  ;;  %780 = vperm.xlu0 %2513, %v2812_v14   ;;  %v3062_v5 = vpop.permute.xlu2 %516 }
  0xdc   : > { %2514 = vset.pattern.permute.xlu1 %v2673_v2 }
  0xdd   : > { %784 = vperm.xlu1 %2514, %v2782_v9   ;;  %v3065_v6 = vpop.permute.xlu1 %448  ;;  %788 = vperm.xlu2 %2512, %v2807_v13   ;;  %v3068_v7 = vpop.permute.xlu0 %443 }
  0xde   : > { %4724 = vst [vmem:[#allocation32_spill] sm:$0xff] %v3065_v6  ;;  %800 = vperm.xlu0 %2513, %v2830_v17   ;;  %v3071_v11 = vpop.permute.xlu2 %528 }
  0xdf   : > { %4725 = vst [vmem:[#allocation33_spill] sm:$0xff] %v3068_v7 }
  0xe0   : > { %4726 = vst [vmem:[#allocation34_spill] sm:$0xff] %v3071_v11 }
  0xe5   : > { %792 = vperm.xlu1 %2514, %v2777_v8   ;;  %v3074_v41 = vpop.permute.xlu1 %463  ;;  %796 = vperm.xlu2 %2512, %v2802_v12   ;;  %v3077_v61 = vpop.permute.xlu0 %458 }
  0xe6   : > { %4727 = vst [vmem:[#allocation35_spill] sm:$0xff] %v3074_v41  ;;  %812 = vperm.xlu0 %2513, %v2848_v20   ;;  %v3080_v2 = vpop.permute.xlu2 %536 }
  0xe7   : > { %4728 = vst [vmem:[#allocation36_spill] sm:$0xff] %v3077_v61 }
  0xe8   : > { %4729 = vst [vmem:[#allocation37_spill] sm:$0xff] %v3080_v2 }
  0xed   : > { %804 = vperm.xlu1 %2514, %v2825_v16   ;;  %v3083_v58 = vpop.permute.xlu1 %478  ;;  %808 = vperm.xlu2 %2512, %v2820_v15   ;;  %v3086_v55 = vpop.permute.xlu0 %473 }
  0xee   : > { %4730 = vst [vmem:[#allocation38_spill] sm:$0xff] %v3083_v58  ;;  %824 = vperm.xlu0 %2513, %v2866_v23   ;;  %v3089_v52 = vpop.permute.xlu2 %548 }
  0xef   : > { %4731 = vst [vmem:[#allocation39_spill] sm:$0xff] %v3086_v55 }
  0xf0   : > { %4732 = vst [vmem:[#allocation40_spill] sm:$0xff] %v3089_v52 }
  0xf5   : > { %816 = vperm.xlu1 %2514, %v2843_v19   ;;  %820 = vperm.xlu2 %2512, %v2838_v18  }
  0xf6   : > { %836 = vperm.xlu0 %2513, %v2884_v26   ;;  %v3094_v48 = vpop.permute.xlu1 %524  ;;  %v3096_v42 = vpop.permute.xlu2 %560 }
  0xf7   : > { %4733 = vst [vmem:[#allocation41_spill] sm:$0xff] %v3094_v48  ;;  %v3098_v46 = vpop.permute.xlu0 %520 }
  0xf8   : > { %4734 = vst [vmem:[#allocation42_spill] sm:$0xff] %v3096_v42 }
  0xf9   : > { %4735 = vst [vmem:[#allocation43_spill] sm:$0xff] %v3098_v46 }
  0xfd   : > { %828 = vperm.xlu1 %2514, %v2861_v22   ;;  %832 = vperm.xlu2 %2512, %v2856_v21  }
  0xfe   : > { %848 = vperm.xlu0 %2513, %v2902_v29   ;;  %v3103_v45 = vpop.permute.xlu1 %532  ;;  %v3105_v58 = vpop.permute.xlu2 %572 }
  0xff   : > { %4736 = vst [vmem:[#allocation44_spill] sm:$0xff] %v3103_v45  ;;  %v541_v44 = vpop.permute.xlu0 %540 }
 0x100   : > { %4737 = vst [vmem:[#allocation45_spill] sm:$0xff] %v3105_v58 }
 0x105   : > { %840 = vperm.xlu1 %2514, %v2879_v25   ;;  %844 = vperm.xlu2 %2512, %v2874_v24  }
 0x106   : > { %860 = vperm.xlu0 %2513, %v2920_v32   ;;  %v3110_v42 = vpop.permute.xlu1 %544  ;;  %v3112_v48 = vpop.permute.xlu2 %584 }
 0x107   : > { %4738 = vst [vmem:[#allocation46_spill] sm:$0xff] %v3110_v42  ;;  %v3114_v41 = vpop.permute.xlu0 %552 }
 0x10d   : > { %852 = vperm.xlu1 %2514, %v2897_v28   ;;  %856 = vperm.xlu2 %2512, %v2892_v27  }
 0x10e   : > { %872 = vperm.xlu0 %2513, %v2938_v35   ;;  %v3119_v58 = vpop.permute.xlu1 %556  ;;  %v3121_v45 = vpop.permute.xlu2 %596 }
 0x10f   : > { %4739 = vst [vmem:[#allocation47_spill] sm:$0xff] %v3119_v58  ;;  %v3123_v50 = vpop.permute.xlu0 %564 }
 0x115   : > { %864 = vperm.xlu1 %2514, %v2915_v31   ;;  %868 = vperm.xlu2 %2512, %v2910_v30  }
 0x116   : > { %884 = vperm.xlu0 %2513, %v2956_v38   ;;  %v3128_v42 = vpop.permute.xlu1 %568  ;;  %v3130_v43 = vpop.permute.xlu2 %608 }
 0x117   : > { %4740 = vst [vmem:[#allocation48_spill] sm:$0xff] %v3128_v42  ;;  %v3132_v52 = vpop.permute.xlu0 %576  ;;  %v2674_v42 = vmov 2  }
 0x11d   : > { %876 = vperm.xlu1 %2514, %v2933_v34   ;;  %880 = vperm.xlu2 %2512, %v2928_v33  }
 0x11e   : > { %896 = vperm.xlu0 %2513, %v2969_v40   ;;  %v3137_v58 = vpop.permute.xlu1 %580  ;;  %v3139_v55 = vpop.permute.xlu2 %620 }
 0x11f   : > { %4741 = vst [vmem:[#allocation49_spill] sm:$0xff] %v3137_v58  ;;  %v3141_v46 = vpop.permute.xlu0 %588 }
 0x125   : > { %888 = vperm.xlu1 %2514, %v2951_v37   ;;  %892 = vperm.xlu2 %2512, %v2946_v36  }
 0x126   : > { %2516 = vset.pattern.permute.xlu0 %v2674_v42  ;;  %v3145_v2 = vpop.permute.xlu1 %592  ;;  %v3147_v6 = vpop.permute.xlu2 %632 }
 0x127   : > { %1040 = vperm.xlu0 %2516, %v2812_v14   ;;  %v3150_v61 = vpop.permute.xlu0 %600 }
 0x12d   : > { %900 = vperm.xlu1 %2514, %v2964_v39   ;;  %2515 = vset.pattern.permute.xlu2 %v2674_v42 }
 0x12e   : > { %v3153_v58 = vpop.permute.xlu1 %604  ;;  %1036 = vperm.xlu2 %2515, %v2787_v10  }
 0x12f   : > { %1060 = vperm.xlu0 %2516, %v2830_v17   ;;  %v3157_v3 = vpop.permute.xlu0 %612  ;;  %v3159_v49 = vpop.permute.xlu2 %776 }
 0x135   : > { %2517 = vset.pattern.permute.xlu1 %v2674_v42 }
 0x136   : > { %1044 = vperm.xlu1 %2517, %v2782_v9   ;;  %v3162_v11 = vpop.permute.xlu1 %616  ;;  %1048 = vperm.xlu2 %2515, %v2807_v13  }
 0x137   : > { %1072 = vperm.xlu0 %2516, %v2848_v20   ;;  %v3166_v39 = vpop.permute.xlu0 %624  ;;  %v3168_v7 = vpop.permute.xlu2 %788  ;;  %v3184_v20 = vld [vmem:[%s2797_s30] ss:$0 sm:$0xff] }
 0x13e   : > { %1052 = vperm.xlu1 %2517, %v2777_v8   ;;  %v3171_v10 = vpop.permute.xlu1 %628  ;;  %1056 = vperm.xlu2 %2515, %v2802_v12  }
 0x13f   : > { %4742 = vst [vmem:[#allocation50_spill] sm:$0xff] %v3171_v10  ;;  %1084 = vperm.xlu0 %2516, %v2866_v23   ;;  %v3175_v42 = vpop.permute.xlu0 %636  ;;  %v3177_v9 = vpop.permute.xlu2 %796  ;;  %v650_v23 = vadd.f32 %v3184_v20, %v541_v44  ;;  %v3213_v10 = vstv %s2458_s17 }
 0x140   : > { %4743 = vst [vmem:[#allocation51_spill] sm:$0xff] %v3175_v42 }
 0x141   : > { %4744 = vst [vmem:[#allocation52_spill] sm:$0xff] %v3177_v9  ;;  %v683_v9 = vmin.f32 %v650_v23, 0.0 }
 0x146   : > { %1064 = vperm.xlu1 %2517, %v2825_v16   ;;  %v3180_v13 = vpop.permute.xlu1 %640  ;;  %1068 = vperm.xlu2 %2515, %v2820_v15   ;;  %v3195_v16 = vld [vmem:[%s2797_s30 + $0x1] ss:$0 sm:$0xff] }
 0x147   : > { %4745 = vst [vmem:[#allocation53_spill] sm:$0xff] %v3180_v13  ;;  %1096 = vperm.xlu0 %2516, %v2884_v26   ;;  %v3187_v8 = vpop.permute.xlu2 %808 }
 0x148   : > { %4746 = vst [vmem:[#allocation54_spill] sm:$0xff] %v3187_v8  ;;  %v3189_v12 = vpop.permute.xlu0 %780  ;;  %v3202_v8 = vstv %s676_s14 }
 0x149   : > { %4747 = vst [vmem:[#allocation55_spill] sm:$0xff] %v3189_v12  ;;  %v3205_v12 = vld [vmem:[%s2797_s30 + $0x4] ss:$0 sm:$0xff]  ;;  %v716_v44 = vmul.f32 %v3202_v8, %v683_v9 }
 0x14a   : > { %v488_v23 = vadd.f32 %v3205_v12, %v3017_v53  ;;  %v661_v53 = vadd.f32 %v3184_v20, %v3112_v48 }
 0x14e   : > { %1076 = vperm.xlu1 %2517, %v2843_v19   ;;  %1080 = vperm.xlu2 %2515, %v2838_v18   ;;  %v653_v19 = vadd.f32 %v3184_v20, %v3114_v41 }
 0x14f   : > { %1108 = vperm.xlu0 %2516, %v2902_v29   ;;  %v3198_v15 = vpop.permute.xlu1 %784  ;;  %v3200_v26 = vpop.permute.xlu2 %820 }
 0x150   : > { %4748 = vst [vmem:[#allocation56_spill] sm:$0xff] %v3198_v15  ;;  %v801_v13 = vpop.permute.xlu0 %800  ;;  %v748_v15 = vadd.f32 %v716_v44, %v488_v23 }
 0x151   : > { %4749 = vst [vmem:[#allocation57_spill] sm:$0xff] %v3200_v26  ;;  %v910_v18 = vadd.f32 %v3195_v16, %v801_v13  ;;  %v686_v26 = vmin.f32 %v653_v19, 0.0 }
 0x153   : > { %v943_v29 = vmin.f32 %v910_v18, 0.0  ;;  %v719_v44 = vmul.f32 %v3202_v8, %v686_v26 }
 0x155   : > { %v976_v42 = vmul.f32 %v3213_v10, %v943_v29  ;;  %v656_v29 = vadd.f32 %v3184_v20, %v3123_v50 }
 0x156   : > { %1088 = vperm.xlu1 %2517, %v2861_v22   ;;  %1092 = vperm.xlu2 %2515, %v2856_v21  }
 0x157   : > { %v3218_v9 = vadd.f32 %v976_v42, %v748_v15  ;;  %1120 = vperm.xlu0 %2516, %v2920_v32   ;;  %v3221_v41 = vpop.permute.xlu1 %792  ;;  %v3223_v13 = vpop.permute.xlu2 %832  ;;  %v491_v15 = vadd.f32 %v3205_v12, %v3026_v56  ;;  %v694_v32 = vmin.f32 %v661_v53, 0.0  ;;  %v689_v19 = vmin.f32 %v656_v29, 0.0 }
 0x158   : > { %v813_v18 = vpop.permute.xlu0 %812  ;;  %v664_v56 = vadd.f32 %v3184_v20, %v3121_v45 }
 0x159   : > { %v913_v22 = vadd.f32 %v3195_v16, %v813_v18  ;;  %v751_v42 = vadd.f32 %v719_v44, %v491_v15  ;;  %v727_v18 = vmul.f32 %v3202_v8, %v694_v32  ;;  %v722_v29 = vmul.f32 %v3202_v8, %v689_v19 }
 0x15a   : > { %v494_v15 = vadd.f32 %v3205_v12, %v3035_v59  ;;  %v697_v45 = vmin.f32 %v664_v56, 0.0  ;;  %v667_v56 = vadd.f32 %v3184_v20, %v3130_v43 }
 0x15b   : > { %v946_v21 = vmin.f32 %v913_v22, 0.0 }
 0x15c   : > { %v700_v43 = vmin.f32 %v667_v56, 0.0 }
 0x15d   : > { %v979_v23 = vmul.f32 %v3213_v10, %v946_v21 }
 0x15e   : > { %1100 = vperm.xlu1 %2517, %v2879_v25   ;;  %1104 = vperm.xlu2 %2515, %v2874_v24   ;;  %v659_v24 = vadd.f32 %v3184_v20, %v3132_v52 }
 0x15f   : > { %v3236_v48 = vadd.f32 %v979_v23, %v751_v42  ;;  %1132 = vperm.xlu0 %2516, %v2938_v35   ;;  %v3239_v26 = vpop.permute.xlu1 %804  ;;  %v845_v50 = vpop.permute.xlu2 %844  ;;  %v499_v35 = vadd.f32 %v3205_v12, %v3012_v51  ;;  %v754_v23 = vadd.f32 %v722_v29, %v494_v15 }
 0x160   : > { %4750 = vst [vmem:[#allocation58_spill] sm:$0xff] %v3239_v26  ;;  %v921_v53 = vadd.f32 %v3195_v16, %v845_v50  ;;  %v825_v44 = vpop.permute.xlu0 %824  ;;  %v692_v50 = vmin.f32 %v659_v24, 0.0 }
 0x161   : > { %v916_v25 = vadd.f32 %v3195_v16, %v825_v44  ;;  %v759_v32 = vadd.f32 %v727_v18, %v499_v35  ;;  %v730_v18 = vmul.f32 %v3202_v8, %v697_v45 }
 0x162   : > { %v954_v22 = vmin.f32 %v921_v53, 0.0  ;;  %v725_v29 = vmul.f32 %v3202_v8, %v692_v50  ;;  %v670_v50 = vadd.f32 %v3184_v20, %v3139_v55 }
 0x163   : > { %v949_v21 = vmin.f32 %v916_v25, 0.0  ;;  %v497_v25 = vadd.f32 %v3205_v12, %v3044_v62 }
 0x164   : > { %v987_v42 = vmul.f32 %v3213_v10, %v954_v22  ;;  %v703_v55 = vmin.f32 %v670_v50, 0.0 }
 0x165   : > { %v982_v19 = vmul.f32 %v3213_v10, %v949_v21  ;;  %v757_v21 = vadd.f32 %v725_v29, %v497_v25 }
 0x166   : > { %v3255_v26 = vadd.f32 %v987_v42, %v759_v32  ;;  %1112 = vperm.xlu1 %2517, %v2897_v28   ;;  %1116 = vperm.xlu2 %2515, %v2892_v27   ;;  %v662_v27 = vadd.f32 %v3184_v20, %v3141_v46 }
 0x167   : > { %v3259_v51 = vadd.f32 %v982_v19, %v754_v23  ;;  %1144 = vperm.xlu0 %2516, %v2956_v38   ;;  %v3262_v52 = vpop.permute.xlu1 %816  ;;  %v857_v59 = vpop.permute.xlu2 %856  ;;  %v502_v38 = vadd.f32 %v3205_v12, %v3021_v54  ;;  %v733_v23 = vmul.f32 %v3202_v8, %v700_v43  ;;  %v736_v43 = vmul.f32 %v3202_v8, %v703_v55 }
 0x168   : > { %v924_v53 = vadd.f32 %v3195_v16, %v857_v59  ;;  %v837_v44 = vpop.permute.xlu0 %836  ;;  %v695_v32 = vmin.f32 %v662_v27, 0.0  ;;  %v904_v55 = vadd.f32 %v3195_v16, %v3159_v49  ;;  %v511_v49 = vadd.f32 %v3205_v12, %v3048_v63 }
 0x169   : > { %v919_v28 = vadd.f32 %v3195_v16, %v837_v44  ;;  %v762_v22 = vadd.f32 %v730_v18, %v502_v38 }
 0x16a   : > { %v957_v24 = vmin.f32 %v924_v53, 0.0  ;;  %v728_v18 = vmul.f32 %v3202_v8, %v695_v32  ;;  %v500_v53 = vadd.f32 %v3205_v12, %v3053_v1  ;;  %v2675_v1 = vmov 3  }
 0x16b   : > { %v952_v35 = vmin.f32 %v919_v28, 0.0 }
 0x16c   : > { %v990_v15 = vmul.f32 %v3213_v10, %v957_v24  ;;  %v760_v28 = vadd.f32 %v728_v18, %v500_v53  ;;  %v644_v18 = vadd.f32 %v3184_v20, %v3062_v5 }
 0x16d   : > { %v985_v45 = vmul.f32 %v3213_v10, %v952_v35 }
 0x16e   : > { %v3278_v42 = vadd.f32 %v990_v15, %v762_v22  ;;  %1124 = vperm.xlu1 %2517, %v2915_v31   ;;  %1128 = vperm.xlu2 %2515, %v2910_v30   ;;  %v665_v30 = vadd.f32 %v3184_v20, %v3150_v61  ;;  %v673_v15 = vadd.f32 %v3184_v20, %v3147_v6 }
 0x16f   : > { %v3282_v46 = vadd.f32 %v985_v45, %v757_v21  ;;  %1156 = vperm.xlu0 %2516, %v2969_v40   ;;  %v3285_v54 = vpop.permute.xlu1 %828  ;;  %v869_v62 = vpop.permute.xlu2 %868  ;;  %v505_v40 = vadd.f32 %v3205_v12, %v3030_v57  ;;  %v663_v57 = vadd.f32 %v3184_v20, %v3145_v2  ;;  %v668_v21 = vadd.f32 %v3184_v20, %v3157_v3 }
 0x170   : > { %v927_v19 = vadd.f32 %v3195_v16, %v869_v62  ;;  %v849_v59 = vpop.permute.xlu0 %848  ;;  %v698_v38 = vmin.f32 %v665_v30, 0.0  ;;  %v508_v45 = vadd.f32 %v3205_v12, %v3039_v60  ;;  %v501_v60 = vadd.f32 %v3205_v12, %v3051_v0 }
 0x171   : > { %v922_v31 = vadd.f32 %v3195_v16, %v849_v59  ;;  %v765_v29 = vadd.f32 %v733_v23, %v505_v40  ;;  %v503_v23 = vadd.f32 %v3205_v12, %v3059_v4  ;;  %v696_v6 = vmin.f32 %v663_v57, 0.0 }
 0x172   : > { %v960_v56 = vmin.f32 %v927_v19, 0.0  ;;  %v731_v2 = vmul.f32 %v3202_v8, %v698_v38  ;;  %v768_v19 = vadd.f32 %v736_v43, %v508_v45  ;;  %v706_v59 = vmin.f32 %v673_v15, 0.0 }
 0x173   : > { %v955_v44 = vmin.f32 %v922_v31, 0.0  ;;  %v701_v3 = vmin.f32 %v668_v21, 0.0  ;;  %v729_v4 = vmul.f32 %v3202_v8, %v696_v6  ;;  %v4752_v6 = vld [vmem:[#allocation34_spill] sm:$0xff] }
 0x174   : > { %v993_v27 = vmul.f32 %v3213_v10, %v960_v56  ;;  %v763_v30 = vadd.f32 %v731_v2, %v503_v23  ;;  %v666_v56 = vadd.f32 %v3184_v20, %v3153_v58  ;;  %v671_v58 = vadd.f32 %v3184_v20, %v3166_v39  ;;  %v3363_v23 = vld [vmem:[%s2797_s30 + $0x2] ss:$0 sm:$0xff] }
 0x175   : > { %v988_v24 = vmul.f32 %v3213_v10, %v955_v44  ;;  %v761_v15 = vadd.f32 %v729_v4, %v501_v60  ;;  %v937_v2 = vmin.f32 %v904_v55, 0.0  ;;  %v907_v55 = vadd.f32 %v3195_v16, %v3168_v7  ;;  %v4759_v7 = vld [vmem:[#allocation36_spill] sm:$0xff] }
 0x176   : > { %v3301_v25 = vadd.f32 %v993_v27, %v765_v29  ;;  %1136 = vperm.xlu1 %2517, %v2933_v34   ;;  %1140 = vperm.xlu2 %2515, %v2928_v33   ;;  %v739_v29 = vmul.f32 %v3202_v8, %v706_v59  ;;  %v677_v27 = vmin.f32 %v644_v18, 0.0  ;;  %v704_v45 = vmin.f32 %v671_v58, 0.0  ;;  %v4754_v18 = vld [vmem:[#allocation25_spill] sm:$0xff]  ;;  %v4758_v58 = vld [vmem:[#allocation51_spill] sm:$0xff] }
 0x177   : > { %v3307_v61 = vadd.f32 %v988_v24, %v760_v28  ;;  %2519 = vset.pattern.permute.xlu0 %v2675_v1  ;;  %v3310_v35 = vpop.permute.xlu1 %840  ;;  %v881_v22 = vpop.permute.xlu2 %880  ;;  %v734_v28 = vmul.f32 %v3202_v8, %v701_v3  ;;  %v482_v24 = vadd.f32 %v3205_v12, %v2999_v47  ;;  %v4755_v3 = vld [vmem:[#allocation31_spill] sm:$0xff] }
 0x178   : > { %v930_v34 = vadd.f32 %v3195_v16, %v881_v22  ;;  %1300 = vperm.xlu0 %2519, %v2812_v14   ;;  %v861_v33 = vpop.permute.xlu0 %860  ;;  %v771_v39 = vadd.f32 %v739_v29, %v511_v49  ;;  %v669_v29 = vadd.f32 %v3184_v20, %v3162_v11 }
 0x179   : > { %v925_v32 = vadd.f32 %v3195_v16, %v861_v33 }
 0x17a   : > { %v963_v62 = vmin.f32 %v930_v34, 0.0  ;;  %v699_v34 = vmin.f32 %v666_v56, 0.0 }
 0x17b   : > { %v958_v50 = vmin.f32 %v925_v32, 0.0  ;;  %v710_v32 = vmul.f32 %v3202_v8, %v677_v27 }
 0x17c   : > { %v996_v14 = vmul.f32 %v3213_v10, %v963_v62  ;;  %v732_v60 = vmul.f32 %v3202_v8, %v699_v34 }
 0x17d   : > { %v991_v31 = vmul.f32 %v3213_v10, %v958_v50  ;;  %v647_v50 = vadd.f32 %v3184_v20, %v4752_v6 }
 0x17e   : > { %v3329_v40 = vadd.f32 %v996_v14, %v768_v19  ;;  %1148 = vperm.xlu1 %2517, %v2951_v37   ;;  %1152 = vperm.xlu2 %2515, %v2946_v36   ;;  %v4753_v14 = vld [vmem:[#allocation18_spill] sm:$0xff] }
 0x17f   : > { %v3338_v53 = vadd.f32 %v991_v31, %v763_v30  ;;  %v853_v5 = vpop.permute.xlu1 %852  ;;  %v893_v44 = vpop.permute.xlu2 %892  ;;  %v485_v30 = vadd.f32 %v3205_v12, %v4754_v18  ;;  %v504_v31 = vadd.f32 %v3205_v12, %v4755_v3  ;;  %v680_v11 = vmin.f32 %v647_v50, 0.0  ;;  %v4761_v18 = vld [vmem:[#allocation37_spill] sm:$0xff] }
 0x180   : > { %v923_v37 = vadd.f32 %v3195_v16, %v853_v5  ;;  %v933_v36 = vadd.f32 %v3195_v16, %v893_v44  ;;  %1320 = vperm.xlu0 %2519, %v2830_v17   ;;  %v873_v0 = vpop.permute.xlu0 %872  ;;  %v4751_v17 = vld [vmem:[#allocation33_spill] sm:$0xff]  ;;  %v970_v44 = vmul.f32 %v3213_v10, %v937_v2  ;;  %v649_v3 = vadd.f32 %v3184_v20, %v4761_v18 }
 0x181   : > { %v928_v38 = vadd.f32 %v3195_v16, %v873_v0  ;;  %v506_v43 = vadd.f32 %v3205_v12, %v4751_v17  ;;  %v4756_v5 = vld [vmem:[#allocation9_spill] sm:$0xff]  ;;  %v764_v34 = vadd.f32 %v732_v60, %v504_v31  ;;  %v4762_v60 = vld [vmem:[#allocation43_spill] sm:$0xff] }
 0x182   : > { %v956_v57 = vmin.f32 %v923_v37, 0.0  ;;  %v966_v22 = vmin.f32 %v933_v36, 0.0  ;;  %v4757_v36 = vld [vmem:[#allocation14_spill] sm:$0xff] }
 0x183   : > { %v961_v33 = vmin.f32 %v928_v38, 0.0  ;;  %v766_v63 = vadd.f32 %v734_v28, %v506_v43  ;;  %v737_v28 = vmul.f32 %v3202_v8, %v704_v45  ;;  %v674_v38 = vadd.f32 %v3184_v20, %v4758_v58  ;;  %v4766_v58 = vld [vmem:[#allocation15_spill] sm:$0xff] }
 0x184   : > { %v989_v21 = vmul.f32 %v3213_v10, %v956_v57  ;;  %v999_v47 = vmul.f32 %v3213_v10, %v966_v22  ;;  %v742_v22 = vadd.f32 %v710_v32, %v482_v24  ;;  %v3394_v43 = vstv %s3354_s20  ;;  %v4760_v32 = vld [vmem:[#allocation32_spill] sm:$0xff] }
 0x185   : > { %v994_v62 = vmul.f32 %v3213_v10, %v961_v33  ;;  %v507_v50 = vadd.f32 %v3205_v12, %v4760_v32 }
 0x186   : > { %v3367_v19 = vadd.f32 %v989_v21, %v761_v15  ;;  %v3369_v59 = vadd.f32 %v999_v47, %v771_v39  ;;  %1160 = vperm.xlu1 %2517, %v4753_v14   ;;  %2518 = vset.pattern.permute.xlu2 %v2675_v1  ;;  %v509_v15 = vadd.f32 %v3205_v12, %v4759_v7  ;;  %v702_v21 = vmin.f32 %v669_v29, 0.0  ;;  %v4763_v29 = vld [vmem:[#allocation8_spill] sm:$0xff] }
 0x187   : > { %v3378_v4 = vadd.f32 %v994_v62, %v766_v63  ;;  %v865_v56 = vpop.permute.xlu1 %864  ;;  %1296 = vperm.xlu2 %2518, %v4756_v5   ;;  %v1002_v2 = vadd.f32 %v970_v44, %v742_v22  ;;  %v940_v47 = vmin.f32 %v907_v55, 0.0  ;;  %v707_v62 = vmin.f32 %v674_v38, 0.0  ;;  %v4767_v22 = vld [vmem:[#allocation52_spill] sm:$0xff] }
 0x188   : > { %v926_v37 = vadd.f32 %v3195_v16, %v865_v56  ;;  %1332 = vperm.xlu0 %2519, %v4757_v36   ;;  %v885_v0 = vpop.permute.xlu0 %884  ;;  %v1037_v27 = vpop.permute.xlu2 %1036  ;;  %v769_v45 = vadd.f32 %v737_v28, %v509_v15  ;;  %v713_v14 = vmul.f32 %v3202_v8, %v680_v11  ;;  %v645_v56 = vadd.f32 %v3184_v20, %v4762_v60 }
 0x189   : > { %v931_v49 = vadd.f32 %v3195_v16, %v885_v0  ;;  %v1164_v57 = vadd.f32 %v3363_v23, %v1037_v27  ;;  %v735_v36 = vmul.f32 %v3202_v8, %v702_v21  ;;  %v973_v0 = vmul.f32 %v3213_v10, %v940_v47  ;;  %v4765_v27 = vld [vmem:[#allocation50_spill] sm:$0xff]  ;;  %v4769_v21 = vld [vmem:[#allocation39_spill] sm:$0xff] }
 0x18a   : > { %v959_v17 = vmin.f32 %v926_v37, 0.0  ;;  %v4764_v37 = vld [vmem:[#allocation11_spill] sm:$0xff]  ;;  %v672_v28 = vadd.f32 %v3184_v20, %v4765_v27  ;;  %v909_v11 = vadd.f32 %v3195_v16, %v4767_v22  ;;  %v745_v15 = vadd.f32 %v713_v14, %v485_v30  ;;  %v4774_v22 = vld [vmem:[#allocation53_spill] sm:$0xff] }
 0x18b   : > { %v964_v33 = vmin.f32 %v931_v49, 0.0  ;;  %v1197_v39 = vmin.f32 %v1164_v57, 0.0  ;;  %v740_v57 = vmul.f32 %v3202_v8, %v707_v62  ;;  %v512_v47 = vadd.f32 %v3205_v12, %v4769_v21 }
 0x18c   : > { %v992_v63 = vmul.f32 %v3213_v10, %v959_v17  ;;  %v767_v62 = vadd.f32 %v735_v36, %v507_v50  ;;  %v705_v32 = vmin.f32 %v672_v28, 0.0  ;;  %v4771_v28 = vld [vmem:[#allocation7_spill] sm:$0xff] }
 0x18d   : > { %v997_v6 = vmul.f32 %v3213_v10, %v964_v33  ;;  %v1230_v24 = vmul.f32 %v3394_v43, %v1197_v39  ;;  %v4768_v33 = vld [vmem:[#allocation55_spill] sm:$0xff]  ;;  %v772_v60 = vadd.f32 %v740_v57, %v512_v47 }
 0x18e   : > { %v3406_v31 = vadd.f32 %v992_v63, %v764_v34  ;;  %2520 = vset.pattern.permute.xlu1 %v2675_v1  ;;  %v682_v34 = vmin.f32 %v649_v3, 0.0  ;;  %v905_v39 = vadd.f32 %v3195_v16, %v4768_v33  ;;  %v678_v63 = vmin.f32 %v645_v56, 0.0 }
 0x18f   : > { %v3411_v5 = vadd.f32 %v997_v6, %v769_v45  ;;  %v3413_v44 = vadd.f32 %v1230_v24, %v1002_v2  ;;  %1304 = vperm.xlu1 %2520, %v4763_v29   ;;  %v877_v55 = vpop.permute.xlu1 %876  ;;  %1308 = vperm.xlu2 %2518, %v4764_v37   ;;  %v1005_v24 = vadd.f32 %v973_v0, %v745_v15  ;;  %v942_v29 = vmin.f32 %v909_v11, 0.0 }
 0x190   : > { %v929_v1 = vadd.f32 %v3195_v16, %v877_v55  ;;  %1344 = vperm.xlu0 %2519, %v4766_v58   ;;  %v897_v38 = vpop.permute.xlu0 %896  ;;  %v1049_v49 = vpop.permute.xlu2 %1048  ;;  %v715_v3 = vmul.f32 %v3202_v8, %v682_v34  ;;  %v4770_v55 = vld [vmem:[#allocation40_spill] sm:$0xff]  ;;  %v938_v27 = vmin.f32 %v905_v39, 0.0  ;;  %v711_v50 = vmul.f32 %v3202_v8, %v678_v63  ;;  %v4772_v58 = vld [vmem:[#allocation10_spill] sm:$0xff] }
 0x191   : > { %v934_v17 = vadd.f32 %v3195_v16, %v897_v38  ;;  %v1167_v7 = vadd.f32 %v3363_v23, %v1049_v49  ;;  %v652_v37 = vadd.f32 %v3184_v20, %v4770_v55  ;;  %v4773_v38 = vld [vmem:[#allocation20_spill] sm:$0xff]  ;;  %v738_v57 = vmul.f32 %v3202_v8, %v705_v32  ;;  %v4776_v34 = vld [vmem:[#allocation26_spill] sm:$0xff] }
 0x192   : > { %v962_v2 = vmin.f32 %v929_v1, 0.0  ;;  %v487_v49 = vadd.f32 %v3205_v12, %v4773_v38  ;;  %v675_v11 = vadd.f32 %v3184_v20, %v4774_v22  ;;  %v483_v33 = vadd.f32 %v3205_v12, %v4776_v34 }
 0x193   : > { %v967_v45 = vmin.f32 %v934_v17, 0.0  ;;  %v1200_v6 = vmin.f32 %v1167_v7, 0.0  ;;  %v4775_v7 = vld [vmem:[#allocation16_spill] sm:$0xff]  ;;  %v975_v39 = vmul.f32 %v3213_v10, %v942_v29 }
 0x194   : > { %v995_v18 = vmul.f32 %v3213_v10, %v962_v2  ;;  %v4777_v2 = vld [vmem:[#allocation54_spill] sm:$0xff]  ;;  %v708_v29 = vmin.f32 %v675_v11, 0.0 }
 0x195   : > { %v1000_v30 = vmul.f32 %v3213_v10, %v967_v45  ;;  %v1233_v14 = vmul.f32 %v3394_v43, %v1200_v6  ;;  %v912_v21 = vadd.f32 %v3195_v16, %v4777_v2  ;;  %v4778_v45 = vld [vmem:[#allocation35_spill] sm:$0xff]  ;;  %v4783_v2 = vld [vmem:[#allocation12_spill] sm:$0xff] }
 0x196   : > { %v3438_v56 = vadd.f32 %v995_v18, %v767_v62  ;;  %v510_v6 = vadd.f32 %v3205_v12, %v4778_v45  ;;  %v971_v62 = vmul.f32 %v3213_v10, %v938_v27  ;;  %v747_v18 = vadd.f32 %v715_v3, %v487_v49  ;;  %v4780_v27 = vld [vmem:[#allocation21_spill] sm:$0xff]  ;;  %v4781_v49 = vld [vmem:[#allocation42_spill] sm:$0xff] }
 0x197   : > { %v3441_v36 = vadd.f32 %v1000_v30, %v772_v60  ;;  %v3443_v0 = vadd.f32 %v1233_v14, %v1005_v24  ;;  %1312 = vperm.xlu1 %2520, %v4771_v28   ;;  %v889_v1 = vpop.permute.xlu1 %888  ;;  %1316 = vperm.xlu2 %2518, %v4772_v58   ;;  %v685_v60 = vmin.f32 %v652_v37, 0.0  ;;  %v743_v30 = vadd.f32 %v711_v50, %v483_v33  ;;  %v4779_v58 = vld [vmem:[#allocation41_spill] sm:$0xff] }
 0x198   : > { %v932_v17 = vadd.f32 %v3195_v16, %v889_v1  ;;  %1356 = vperm.xlu0 %2519, %v4775_v7   ;;  %v1057_v15 = vpop.permute.xlu2 %1056  ;;  %v770_v55 = vadd.f32 %v738_v57, %v510_v6  ;;  %v646_v38 = vadd.f32 %v3184_v20, %v4779_v58  ;;  %v1007_v22 = vadd.f32 %v975_v39, %v747_v18  ;;  %v4782_v33 = vld [vmem:[#allocation13_spill] sm:$0xff] }
 0x199   : > { %v1169_v47 = vadd.f32 %v3363_v23, %v1057_v15  ;;  %v1041_v63 = vpop.permute.xlu0 %1040  ;;  %v945_v7 = vmin.f32 %v912_v21, 0.0  ;;  %v1003_v34 = vadd.f32 %v971_v62, %v743_v30  ;;  %v718_v50 = vmul.f32 %v3202_v8, %v685_v60  ;;  %v4785_v62 = vld [vmem:[#allocation17_spill] sm:$0xff] }
 0x19a   : > { %v965_v24 = vmin.f32 %v932_v17, 0.0  ;;  %v1165_v32 = vadd.f32 %v3363_v23, %v1041_v63  ;;  %v490_v17 = vadd.f32 %v3205_v12, %v4780_v27  ;;  %v655_v57 = vadd.f32 %v3184_v20, %v4781_v49  ;;  %v4786_v60 = vld [vmem:[#allocation57_spill] sm:$0xff] }
 0x19b   : > { %v1202_v14 = vmin.f32 %v1169_v47, 0.0  ;;  %v741_v21 = vmul.f32 %v3202_v8, %v708_v29  ;;  %v4784_v47 = vld [vmem:[#allocation56_spill] sm:$0xff]  ;;  %v978_v18 = vmul.f32 %v3213_v10, %v945_v7  ;;  %v915_v30 = vadd.f32 %v3195_v16, %v4786_v60  ;;  %v4787_v29 = vld [vmem:[#allocation38_spill] sm:$0xff] }
 0x19c   : > { %v998_v28 = vmul.f32 %v3213_v10, %v965_v24  ;;  %v1198_v1 = vmin.f32 %v1165_v32, 0.0  ;;  %v906_v63 = vadd.f32 %v3195_v16, %v4784_v47  ;;  %v679_v32 = vmin.f32 %v646_v38, 0.0  ;;  %v4788_v47 = vld [vmem:[#allocation44_spill] sm:$0xff]  ;;  %v3518_v60 = vld [vmem:[%s4671_s1 + $0x58] sm:$0xff] }
 0x19d   : > { %v1235_v15 = vmul.f32 %v3394_v43, %v1202_v14  ;;  %4791 = vst [vmem:[#allocation33_spill] sm:$0xff] %v3518_v60 }
 0x19e   : > { %v3470_v3 = vadd.f32 %v998_v28, %v770_v55  ;;  %v1231_v37 = vmul.f32 %v3394_v43, %v1198_v1  ;;  %v513_v28 = vadd.f32 %v3205_v12, %v4787_v29  ;;  %v712_v49 = vmul.f32 %v3202_v8, %v679_v32 }
 0x19f   : > { %v3476_v11 = vadd.f32 %v1235_v15, %v1007_v22  ;;  %1324 = vperm.xlu1 %2520, %v4782_v33   ;;  %v901_v39 = vpop.permute.xlu1 %900  ;;  %1328 = vperm.xlu2 %2518, %v4783_v2   ;;  %v750_v22 = vadd.f32 %v718_v50, %v490_v17  ;;  %v688_v15 = vmin.f32 %v655_v57, 0.0  ;;  %v4790_v57 = vld [vmem:[#allocation22_spill] sm:$0xff]  ;;  %v908_v29 = vadd.f32 %v3195_v16, %v3221_v41 }
 0x1a0   : > { %v3483_v45 = vadd.f32 %v1231_v37, %v1003_v34  ;;  %v935_v6 = vadd.f32 %v3195_v16, %v901_v39  ;;  %1368 = vperm.xlu0 %2519, %v4785_v62   ;;  %v1069_v24 = vpop.permute.xlu2 %1068  ;;  %v773_v34 = vadd.f32 %v741_v21, %v513_v28  ;;  %v939_v37 = vmin.f32 %v906_v63, 0.0 }
 0x1a1   : > { %v1172_v14 = vadd.f32 %v3363_v23, %v1069_v24  ;;  %v1061_v55 = vpop.permute.xlu0 %1060  ;;  %v1010_v33 = vadd.f32 %v978_v18, %v750_v22  ;;  %v948_v39 = vmin.f32 %v915_v30, 0.0  ;;  %v648_v62 = vadd.f32 %v3184_v20, %v4788_v47  ;;  %v3512_v18 = vld [vmem:[%s4671_s1 + $0x50] sm:$0xff]  ;;  %v4792_v30 = vld [vmem:[#allocation23_spill] sm:$0xff] }
 0x1a2   : > { %v968_v1 = vmin.f32 %v935_v6, 0.0  ;;  %v1170_v58 = vadd.f32 %v3363_v23, %v1061_v55  ;;  %v4789_v6 = vld [vmem:[#allocation45_spill] sm:$0xff]  ;;  %v493_v21 = vadd.f32 %v3205_v12, %v4790_v57  ;;  %v721_v63 = vmul.f32 %v3202_v8, %v688_v15 }
 0x1a3   : > { %v1205_v27 = vmin.f32 %v1172_v14, 0.0  ;;  %v658_v24 = vadd.f32 %v3184_v20, %v4789_v6  ;;  %v484_v14 = vadd.f32 %v3205_v12, %v4792_v30  ;;  %v972_v55 = vmul.f32 %v3213_v10, %v939_v37 }
 0x1a4   : > { %v1001_v38 = vmul.f32 %v3213_v10, %v968_v1  ;;  %v1203_v7 = vmin.f32 %v1170_v58, 0.0  ;;  %v3532_v1 = vld [vmem:[%s4671_s1 + $0xa8] sm:$0xff]  ;;  %v981_v15 = vmul.f32 %v3213_v10, %v948_v39  ;;  %v941_v57 = vmin.f32 %v908_v29, 0.0  ;;  %v3561_v29 = vld [vmem:[%s4671_s1 + $0x70] sm:$0xff] }
 0x1a5   : > { %v1238_v2 = vmul.f32 %v3394_v43, %v1205_v27  ;;  %v918_v27 = vadd.f32 %v3195_v16, %v3223_v13  ;;  %v744_v37 = vadd.f32 %v712_v49, %v484_v14  ;;  %4796 = vst [vmem:[#allocation25_spill] sm:$0xff] %v3561_v29 }
 0x1a6   : > { %v3501_v17 = vadd.f32 %v1001_v38, %v773_v34  ;;  %v1236_v50 = vmul.f32 %v3394_v43, %v1203_v7  ;;  %v681_v38 = vmin.f32 %v648_v62, 0.0  ;;  %v691_v7 = vmin.f32 %v658_v24, 0.0  ;;  %v4793_v24 = vld [vmem:[#allocation46_spill] sm:$0xff] }
 0x1a7   : > { %v3507_v32 = vadd.f32 %v1238_v2, %v1010_v33  ;;  %1336 = vperm.xlu1 %2520, %v3512_v18   ;;  %1340 = vperm.xlu2 %2518, %v3518_v60   ;;  %v753_v2 = vadd.f32 %v721_v63, %v493_v21  ;;  %v951_v60 = vmin.f32 %v918_v27, 0.0  ;;  %v651_v21 = vadd.f32 %v3184_v20, %v4793_v24 }
 0x1a8   : > { %v3527_v28 = vadd.f32 %v1236_v50, %v3218_v9  ;;  %1380 = vperm.xlu0 %2519, %v3532_v1   ;;  %v1045_v58 = vpop.permute.xlu1 %1044  ;;  %v1081_v22 = vpop.permute.xlu2 %1080  ;;  %v1004_v50 = vadd.f32 %v972_v55, %v744_v37  ;;  %v724_v49 = vmul.f32 %v3202_v8, %v691_v7  ;;  %v3555_v55 = vld [vmem:[%s4671_s1 + $0x68] sm:$0xff] }
 0x1a9   : > { %v1166_v34 = vadd.f32 %v3363_v23, %v1045_v58  ;;  %v1175_v41 = vadd.f32 %v3363_v23, %v1081_v22  ;;  %v1073_v9 = vpop.permute.xlu0 %1072  ;;  %v1013_v39 = vadd.f32 %v981_v15, %v753_v2  ;;  %v714_v22 = vmul.f32 %v3202_v8, %v681_v38  ;;  %4795 = vst [vmem:[#allocation18_spill] sm:$0xff] %v3555_v55  ;;  %v4797_v15 = vld [vmem:[#allocation19_spill] sm:$0xff] }
 0x1aa   : > { %v1173_v33 = vadd.f32 %v3363_v23, %v1073_v9  ;;  %v486_v27 = vadd.f32 %v3205_v12, %v4797_v15  ;;  %v974_v9 = vmul.f32 %v3213_v10, %v941_v57  ;;  %v3575_v38 = vld [vmem:[%s4671_s1 + $0xc0] sm:$0xff]  ;;  %v984_v2 = vmul.f32 %v3213_v10, %v951_v60 }
 0x1ab   : > { %v1199_v47 = vmin.f32 %v1166_v34, 0.0  ;;  %v1208_v6 = vmin.f32 %v1175_v41, 0.0  ;;  %v4798_v34 = vld [vmem:[#allocation24_spill] sm:$0xff] }
 0x1ac   : > { %v1206_v30 = vmin.f32 %v1173_v33, 0.0  ;;  %v496_v41 = vadd.f32 %v3205_v12, %v4798_v34 }
 0x1ad   : > { %v1232_v13 = vmul.f32 %v3394_v43, %v1199_v47  ;;  %v1241_v58 = vmul.f32 %v3394_v43, %v1208_v6  ;;  %v4799_v47 = vld [vmem:[#allocation58_spill] sm:$0xff] }
 0x1ae   : > { %v1239_v62 = vmul.f32 %v3394_v43, %v1206_v30  ;;  %v911_v6 = vadd.f32 %v3195_v16, %v4799_v47  ;;  %v746_v30 = vadd.f32 %v714_v22, %v486_v27 }
 0x1af   : > { %v3548_v63 = vadd.f32 %v1232_v13, %v1004_v50  ;;  %v3550_v14 = vadd.f32 %v1241_v58, %v1013_v39  ;;  %1348 = vperm.xlu1 %2520, %v3555_v55   ;;  %1352 = vperm.xlu2 %2518, %v3561_v29   ;;  %v756_v13 = vadd.f32 %v724_v49, %v496_v41  ;;  %v684_v58 = vmin.f32 %v651_v21, 0.0  ;;  %v3597_v21 = vld [vmem:[%s4671_s1 + $0x80] sm:$0xff]  ;;  %v3603_v41 = vld [vmem:[%s4671_s1 + $0x88] sm:$0xff] }
 0x1b0   : > { %v3570_v37 = vadd.f32 %v1239_v62, %v3236_v48  ;;  %1392 = vperm.xlu0 %2519, %v3575_v38   ;;  %v1053_v7 = vpop.permute.xlu1 %1052  ;;  %v1093_v33 = vpop.permute.xlu2 %1092  ;;  %v1006_v15 = vadd.f32 %v974_v9, %v746_v30  ;;  %v944_v55 = vmin.f32 %v911_v6, 0.0  ;;  %v3614_v9 = vld [vmem:[%s4671_s1 + $0xd8] sm:$0xff] }
 0x1b1   : > { %4794 = vst [vmem:[#allocation34_spill] sm:$0xff] %v3550_v14  ;;  %v1168_v50 = vadd.f32 %v3363_v23, %v1053_v7  ;;  %v1178_v57 = vadd.f32 %v3363_v23, %v1093_v33  ;;  %v1085_v48 = vpop.permute.xlu0 %1084  ;;  %v1016_v29 = vadd.f32 %v984_v2, %v756_v13  ;;  %v4800_v14 = vld [vmem:[#allocation47_spill] sm:$0xff]  ;;  %v717_v22 = vmul.f32 %v3202_v8, %v684_v58 }
 0x1b2   : > { %v1176_v39 = vadd.f32 %v3363_v23, %v1085_v48  ;;  %v654_v7 = vadd.f32 %v3184_v20, %v4800_v14  ;;  %v914_v14 = vadd.f32 %v3195_v16, %v3262_v52  ;;  %v977_v48 = vmul.f32 %v3213_v10, %v944_v55 }
 0x1b3   : > { %v1201_v62 = vmin.f32 %v1168_v50, 0.0  ;;  %v1211_v24 = vmin.f32 %v1178_v57, 0.0  ;;  %v4801_v50 = vld [vmem:[#allocation27_spill] sm:$0xff] }
 0x1b4   : > { %v1209_v34 = vmin.f32 %v1176_v39, 0.0  ;;  %v489_v57 = vadd.f32 %v3205_v12, %v4801_v50  ;;  %v687_v39 = vmin.f32 %v654_v7, 0.0  ;;  %v4802_v50 = vld [vmem:[#allocation48_spill] sm:$0xff] }
 0x1b5   : > { %v1234_v60 = vmul.f32 %v3394_v43, %v1201_v62  ;;  %v1244_v47 = vmul.f32 %v3394_v43, %v1211_v24 }
 0x1b6   : > { %v1242_v33 = vmul.f32 %v3394_v43, %v1209_v34  ;;  %v749_v58 = vadd.f32 %v717_v22, %v489_v57  ;;  %v720_v55 = vmul.f32 %v3202_v8, %v687_v39  ;;  %v3643_v57 = vld [vmem:[%s4671_s1 + $0xa0] sm:$0xff] }
 0x1b7   : > { %v3590_v27 = vadd.f32 %v1234_v60, %v1006_v15  ;;  %v3592_v49 = vadd.f32 %v1244_v47, %v1016_v29  ;;  %1360 = vperm.xlu1 %2520, %v3597_v21   ;;  %1364 = vperm.xlu2 %2518, %v3603_v41   ;;  %v947_v15 = vmin.f32 %v914_v14, 0.0  ;;  %v3637_v14 = vld [vmem:[%s4671_s1 + $0x98] sm:$0xff]  ;;  %4805 = vst [vmem:[#allocation14_spill] sm:$0xff] %v3643_v57 }
 0x1b8   : > { %v3609_v29 = vadd.f32 %v1242_v33, %v3259_v51  ;;  %1404 = vperm.xlu0 %2519, %v3614_v9   ;;  %v1065_v2 = vpop.permute.xlu1 %1064  ;;  %v1105_v6 = vpop.permute.xlu2 %1104  ;;  %v1009_v60 = vadd.f32 %v977_v48, %v749_v58  ;;  %4804 = vst [vmem:[#allocation9_spill] sm:$0xff] %v3637_v14  ;;  %v4806_v48 = vld [vmem:[#allocation28_spill] sm:$0xff]  ;;  %v917_v58 = vadd.f32 %v3195_v16, %v3285_v54 }
 0x1b9   : > { %v1171_v30 = vadd.f32 %v3363_v23, %v1065_v2  ;;  %v1181_v52 = vadd.f32 %v3363_v23, %v1105_v6  ;;  %v1097_v51 = vpop.permute.xlu0 %1096  ;;  %v657_v2 = vadd.f32 %v3184_v20, %v4802_v50 }
 0x1ba   : > { %v1179_v13 = vadd.f32 %v3363_v23, %v1097_v51  ;;  %v3655_v51 = vld [vmem:[%s4671_s1 + $0xf0] sm:$0xff] }
 0x1bb   : > { %v1204_v62 = vmin.f32 %v1171_v30, 0.0  ;;  %v1214_v24 = vmin.f32 %v1181_v52, 0.0  ;;  %v492_v30 = vadd.f32 %v3205_v12, %v4806_v48  ;;  %v950_v48 = vmin.f32 %v917_v58, 0.0 }
 0x1bc   : > { %v1212_v34 = vmin.f32 %v1179_v13, 0.0 }
 0x1bd   : > { %v1237_v47 = vmul.f32 %v3394_v43, %v1204_v62  ;;  %v1247_v33 = vmul.f32 %v3394_v43, %v1214_v24 }
 0x1be   : > { %v1245_v6 = vmul.f32 %v3394_v43, %v1212_v34  ;;  %v752_v34 = vadd.f32 %v720_v55, %v492_v30  ;;  %v3677_v30 = vld [vmem:[%s4671_s1 + $0xb0] sm:$0xff] }
 0x1bf   : > { %v3629_v7 = vadd.f32 %v1237_v47, %v1009_v60  ;;  %v3632_v22 = vadd.f32 %v1247_v33, %v3255_v26  ;;  %1372 = vperm.xlu1 %2520, %v3637_v14   ;;  %1376 = vperm.xlu2 %2518, %v3643_v57   ;;  %v980_v26 = vmul.f32 %v3213_v10, %v947_v15 }
 0x1c0   : > { %v3650_v52 = vadd.f32 %v1245_v6, %v3282_v46  ;;  %1416 = vperm.xlu0 %2519, %v3655_v51   ;;  %v1077_v39 = vpop.permute.xlu1 %1076  ;;  %v1117_v13 = vpop.permute.xlu2 %1116  ;;  %v690_v46 = vmin.f32 %v657_v2, 0.0 }
 0x1c1   : > { %4803 = vst [vmem:[#allocation31_spill] sm:$0xff] %v3632_v22  ;;  %v1174_v62 = vadd.f32 %v3363_v23, %v1077_v39  ;;  %v1184_v24 = vadd.f32 %v3363_v23, %v1117_v13  ;;  %v1109_v15 = vpop.permute.xlu0 %1108  ;;  %v1012_v50 = vadd.f32 %v980_v26, %v752_v34  ;;  %v4807_v22 = vld [vmem:[#allocation49_spill] sm:$0xff]  ;;  %v3683_v26 = vld [vmem:[%s4671_s1 + $0xb8] sm:$0xff] }
 0x1c2   : > { %v1182_v60 = vadd.f32 %v3363_v23, %v1109_v15  ;;  %v723_v54 = vmul.f32 %v3202_v8, %v690_v46  ;;  %v660_v13 = vadd.f32 %v3184_v20, %v4807_v22  ;;  %v4808_v20 = vld [vmem:[#allocation29_spill] sm:$0xff]  ;;  %v2609_v46 = vld [vmem:[%s4671_s1 + $0x8] sm:$0xff] }
 0x1c3   : > { %v1207_v47 = vmin.f32 %v1174_v62, 0.0  ;;  %v1217_v33 = vmin.f32 %v1184_v24, 0.0  ;;  %v495_v22 = vadd.f32 %v3205_v12, %v4808_v20  ;;  %v983_v62 = vmul.f32 %v3213_v10, %v950_v48 }
 0x1c4   : > { %v1215_v6 = vmin.f32 %v1182_v60, 0.0  ;;  %v920_v24 = vadd.f32 %v3195_v16, %v3310_v35 }
 0x1c5   : > { %v1240_v57 = vmul.f32 %v3394_v43, %v1207_v47  ;;  %v1250_v14 = vmul.f32 %v3394_v43, %v1217_v33  ;;  %v755_v47 = vadd.f32 %v723_v54, %v495_v22  ;;  %v693_v33 = vmin.f32 %v660_v13, 0.0  ;;  %v3713_v54 = vld [vmem:[%s4671_s1 + $0xc8] sm:$0xff]  ;;  %v3719_v13 = vld [vmem:[%s4671_s1 + $0xd0] sm:$0xff] }
 0x1c6   : > { %v1248_v39 = vmul.f32 %v3394_v43, %v1215_v6  ;;  %v953_v20 = vmin.f32 %v920_v24, 0.0 }
 0x1c7   : > { %v3669_v55 = vadd.f32 %v1240_v57, %v1012_v50  ;;  %v3672_v2 = vadd.f32 %v1250_v14, %v3278_v42  ;;  %1384 = vperm.xlu1 %2520, %v3677_v30   ;;  %1388 = vperm.xlu2 %2518, %v3683_v26   ;;  %v4694_v14 = vmov 5  }
 0x1c8   : > { %v3689_v42 = vadd.f32 %v1248_v39, %v3307_v61  ;;  %2522 = vset.pattern.permute.xlu0 %v4694_v14  ;;  %v1089_v57 = vpop.permute.xlu1 %1088  ;;  %v1129_v58 = vpop.permute.xlu2 %1128  ;;  %v1015_v39 = vadd.f32 %v983_v62, %v755_v47  ;;  %v4809_v62 = vld [vmem:[#allocation30_spill] sm:$0xff] }
 0x1c9   : > { %v1177_v15 = vadd.f32 %v3363_v23, %v1089_v57  ;;  %v1187_v34 = vadd.f32 %v3363_v23, %v1129_v58  ;;  %1575 = vperm.xlu0 %2522, %v2609_v46   ;;  %v1121_v61 = vpop.permute.xlu0 %1120  ;;  %v726_v58 = vmul.f32 %v3202_v8, %v693_v33  ;;  %v498_v24 = vadd.f32 %v3205_v12, %v4809_v62 }
 0x1ca   : > { %v1185_v60 = vadd.f32 %v3363_v23, %v1121_v61 }
 0x1cb   : > { %v1210_v50 = vmin.f32 %v1177_v15, 0.0  ;;  %v1220_v6 = vmin.f32 %v1187_v34, 0.0  ;;  %v986_v15 = vmul.f32 %v3213_v10, %v953_v20  ;;  %v758_v33 = vadd.f32 %v726_v58, %v498_v24  ;;  %v3751_v58 = vld [vmem:[%s4671_s1 + $0xe8] sm:$0xff] }
 0x1cc   : > { %v1218_v48 = vmin.f32 %v1185_v60, 0.0  ;;  %v2612_v60 = vld [vmem:[%s4671_s1 + $0x30] sm:$0xff] }
 0x1cd   : > { %v1243_v16 = vmul.f32 %v3394_v43, %v1210_v50  ;;  %v1253_v35 = vmul.f32 %v3394_v43, %v1220_v6 }
 0x1ce   : > { %v1251_v57 = vmul.f32 %v3394_v43, %v1218_v48 }
 0x1cf   : > { %v3705_v14 = vadd.f32 %v1243_v16, %v1015_v39  ;;  %v3708_v46 = vadd.f32 %v1253_v35, %v3301_v25  ;;  %1396 = vperm.xlu1 %2520, %v3713_v54   ;;  %1400 = vperm.xlu2 %2518, %v3719_v13   ;;  %v1018_v39 = vadd.f32 %v986_v15, %v758_v33  ;;  %v2615_v15 = vld [vmem:[%s4671_s1 + $0x48] sm:$0xff] }
 0x1d0   : > { %v3723_v8 = vadd.f32 %v1251_v57, %v3338_v53  ;;  %v1101_v22 = vpop.permute.xlu1 %1100  ;;  %v1141_v25 = vpop.permute.xlu2 %1140  ;;  %v3745_v57 = vld [vmem:[%s4671_s1 + $0xe0] sm:$0xff] }
 0x1d1   : > { %v1180_v34 = vadd.f32 %v3363_v23, %v1101_v22  ;;  %v1190_v61 = vadd.f32 %v3363_v23, %v1141_v25  ;;  %1595 = vperm.xlu0 %2522, %v2612_v60   ;;  %v1133_v47 = vpop.permute.xlu0 %1132 }
 0x1d2   : > { %v1188_v53 = vadd.f32 %v3363_v23, %v1133_v47 }
 0x1d3   : > { %v1213_v50 = vmin.f32 %v1180_v34, 0.0  ;;  %v1223_v6 = vmin.f32 %v1190_v61, 0.0 }
 0x1d4   : > { %v1221_v48 = vmin.f32 %v1188_v53, 0.0 }
 0x1d5   : > { %v1246_v12 = vmul.f32 %v3394_v43, %v1213_v50  ;;  %v1256_v10 = vmul.f32 %v3394_v43, %v1223_v6  ;;  %v3767_v6 = vld [vmem:[%s2797_s30 + $0x3] ss:$0 sm:$0xff] }
 0x1d6   : > { %v1254_v20 = vmul.f32 %v3394_v43, %v1221_v48 }
 0x1d7   : > { %v3737_v16 = vadd.f32 %v1246_v12, %v1018_v39  ;;  %v3740_v35 = vadd.f32 %v1256_v10, %v3329_v40  ;;  %1408 = vperm.xlu1 %2520, %v3745_v57   ;;  %1412 = vperm.xlu2 %2518, %v3751_v58   ;;  %v3778_v12 = vld [vmem:[%s4671_s1 + $0xf8] sm:$0xff]  ;;  %v4810_v10 = vmov 5  }
 0x1d8   : > { %v3755_v22 = vadd.f32 %v1254_v20, %v3378_v4  ;;  %v1113_v40 = vpop.permute.xlu1 %1112  ;;  %v1153_v25 = vpop.permute.xlu2 %1152 }
 0x1d9   : > { %v1183_v62 = vadd.f32 %v3363_v23, %v1113_v40  ;;  %v1193_v24 = vadd.f32 %v3363_v23, %v1153_v25  ;;  %1607 = vperm.xlu0 %2522, %v2615_v15   ;;  %v1145_v34 = vpop.permute.xlu0 %1144  ;;  %v2618_v25 = vld [vmem:[%s4671_s1 + $0x60] sm:$0xff] }
 0x1da   : > { %v1191_v61 = vadd.f32 %v3363_v23, %v1145_v34 }
 0x1db   : > { %v1216_v60 = vmin.f32 %v1183_v62, 0.0  ;;  %v1226_v47 = vmin.f32 %v1193_v24, 0.0 }
 0x1dc   : > { %v1224_v4 = vmin.f32 %v1191_v61, 0.0  ;;  %v3794_v61 = vstv %s2460_s6 }
 0x1dd   : > { %v1249_v53 = vmul.f32 %v3394_v43, %v1216_v60  ;;  %v1259_v33 = vmul.f32 %v3394_v43, %v1226_v47 }
 0x1de   : > { %v1257_v50 = vmul.f32 %v3394_v43, %v1224_v4 }
 0x1df   : > { %v3770_v48 = vadd.f32 %v1249_v53, %v3367_v19  ;;  %v3773_v39 = vadd.f32 %v1259_v33, %v3369_v59  ;;  %1420 = vperm.xlu1 %2520, %v3778_v12   ;;  %2521 = vset.pattern.permute.xlu2 %v4810_v10  ;;  %v2617_v19 = vld [vmem:[%s4671_s1] sm:$0xff] }
 0x1e0   : > { %v3783_v20 = vadd.f32 %v1257_v50, %v3411_v5  ;;  %v1125_v40 = vpop.permute.xlu1 %1124  ;;  %1571 = vperm.xlu2 %2521, %v2617_v19  }
 0x1e1   : > { %v1186_v59 = vadd.f32 %v3363_v23, %v1125_v40  ;;  %1619 = vperm.xlu0 %2522, %v2618_v25   ;;  %v1157_v62 = vpop.permute.xlu0 %1156  ;;  %v1297_v24 = vpop.permute.xlu2 %1296 }
 0x1e2   : > { %v1194_v15 = vadd.f32 %v3363_v23, %v1157_v62  ;;  %v1424_v5 = vadd.f32 %v3767_v6, %v1297_v24  ;;  %v2620_v62 = vld [vmem:[%s4671_s1 + $0x18] sm:$0xff] }
 0x1e3   : > { %v1219_v34 = vmin.f32 %v1186_v59, 0.0  ;;  %v2619_v59 = vld [vmem:[%s4671_s1 + $0x10] sm:$0xff] }
 0x1e4   : > { %v1227_v60 = vmin.f32 %v1194_v15, 0.0  ;;  %v1457_v47 = vmin.f32 %v1424_v5, 0.0 }
 0x1e5   : > { %v1252_v4 = vmul.f32 %v3394_v43, %v1219_v34 }
 0x1e6   : > { %v1260_v53 = vmul.f32 %v3394_v43, %v1227_v60  ;;  %v1490_v33 = vmul.f32 %v3794_v61, %v1457_v47 }
 0x1e7   : > { %v3800_v50 = vadd.f32 %v1252_v4, %v3406_v31  ;;  %2523 = vset.pattern.permute.xlu1 %v4810_v10 }
 0x1e8   : > { %v3804_v40 = vadd.f32 %v1260_v53, %v3441_v36  ;;  %v3807_v19 = vadd.f32 %v1490_v33, %v3413_v44  ;;  %1579 = vperm.xlu1 %2523, %v2619_v59   ;;  %v1137_v25 = vpop.permute.xlu1 %1136  ;;  %1583 = vperm.xlu2 %2521, %v2620_v62   ;;  %v2621_v36 = vld [vmem:[%s4671_s1 + $0x78] sm:$0xff] }
 0x1e9   : > { %v1189_v31 = vadd.f32 %v3363_v23, %v1137_v25  ;;  %1631 = vperm.xlu0 %2522, %v2621_v36   ;;  %v1309_v44 = vpop.permute.xlu2 %1308  ;;  %v2622_v25 = vld [vmem:[%s4671_s1 + $0x20] sm:$0xff] }
 0x1ea   : > { %v1427_v10 = vadd.f32 %v3767_v6, %v1309_v44  ;;  %v1301_v24 = vpop.permute.xlu0 %1300 }
 0x1eb   : > { %v1222_v15 = vmin.f32 %v1189_v31, 0.0  ;;  %v1425_v5 = vadd.f32 %v3767_v6, %v1301_v24  ;;  %v2623_v31 = vld [vmem:[%s4671_s1 + $0x28] sm:$0xff] }
 0x1ec   : > { %v1460_v34 = vmin.f32 %v1427_v10, 0.0 }
 0x1ed   : > { %v1255_v60 = vmul.f32 %v3394_v43, %v1222_v15  ;;  %v1458_v47 = vmin.f32 %v1425_v5, 0.0 }
 0x1ee   : > { %v1493_v4 = vmul.f32 %v3794_v61, %v1460_v34 }
 0x1ef   : > { %v3824_v53 = vadd.f32 %v1255_v60, %v3438_v56  ;;  %v1491_v33 = vmul.f32 %v3794_v61, %v1458_v47 }
 0x1f0   : > { %v3828_v59 = vadd.f32 %v1493_v4, %v3443_v0  ;;  %1587 = vperm.xlu1 %2523, %v2622_v25   ;;  %v1149_v62 = vpop.permute.xlu1 %1148  ;;  %1591 = vperm.xlu2 %2521, %v2623_v31   ;;  %v2624_v0 = vld [vmem:[%s4671_s1 + $0x90] sm:$0xff] }
 0x1f1   : > { %v3837_v36 = vadd.f32 %v1491_v33, %v3483_v45  ;;  %v1192_v56 = vadd.f32 %v3363_v23, %v1149_v62  ;;  %1643 = vperm.xlu0 %2522, %v2624_v0   ;;  %v1317_v44 = vpop.permute.xlu2 %1316  ;;  %v2625_v62 = vld [vmem:[%s4671_s1 + $0x38] sm:$0xff] }
 0x1f2   : > { %v1429_v10 = vadd.f32 %v3767_v6, %v1317_v44  ;;  %v1321_v24 = vpop.permute.xlu0 %1320 }
 0x1f3   : > { %v1225_v15 = vmin.f32 %v1192_v56, 0.0  ;;  %v1430_v5 = vadd.f32 %v3767_v6, %v1321_v24  ;;  %v2626_v56 = vld [vmem:[%s4671_s1 + $0x40] sm:$0xff] }
 0x1f4   : > { %v1462_v34 = vmin.f32 %v1429_v10, 0.0 }
 0x1f5   : > { %v1258_v60 = vmul.f32 %v3394_v43, %v1225_v15  ;;  %v1463_v47 = vmin.f32 %v1430_v5, 0.0 }
 0x1f6   : > { %v1495_v45 = vmul.f32 %v3794_v61, %v1462_v34 }
 0x1f7   : > { %v3848_v4 = vadd.f32 %v1258_v60, %v3470_v3  ;;  %v1496_v33 = vmul.f32 %v3794_v61, %v1463_v47 }
 0x1f8   : > { %v3852_v25 = vadd.f32 %v1495_v45, %v3476_v11  ;;  %1599 = vperm.xlu1 %2523, %v2625_v62   ;;  %v1161_v31 = vpop.permute.xlu1 %1160  ;;  %1603 = vperm.xlu2 %2521, %v2626_v56   ;;  %v4811_v45 = vld [vmem:[#allocation33_spill] sm:$0xff] }
 0x1f9   : > { %v3861_v0 = vadd.f32 %v1496_v33, %v3527_v28  ;;  %v1195_v3 = vadd.f32 %v3363_v23, %v1161_v31  ;;  %1655 = vperm.xlu0 %2522, %v3532_v1   ;;  %v1329_v11 = vpop.permute.xlu2 %1328 }
 0x1fa   : > { %v1432_v44 = vadd.f32 %v3767_v6, %v1329_v11  ;;  %v1333_v10 = vpop.permute.xlu0 %1332 }
 0x1fb   : > { %v1228_v24 = vmin.f32 %v1195_v3, 0.0  ;;  %v1433_v15 = vadd.f32 %v3767_v6, %v1333_v10 }
 0x1fc   : > { %v1465_v5 = vmin.f32 %v1432_v44, 0.0 }
 0x1fd   : > { %v1261_v34 = vmul.f32 %v3394_v43, %v1228_v24  ;;  %v1466_v60 = vmin.f32 %v1433_v15, 0.0  ;;  %v4812_v24 = vld [vmem:[#allocation34_spill] sm:$0xff] }
 0x1fe   : > { %v1498_v47 = vmul.f32 %v3794_v61, %v1465_v5  ;;  %v4813_v5 = vld [vmem:[#allocation18_spill] sm:$0xff] }
 0x1ff   : > { %v3870_v28 = vadd.f32 %v1261_v34, %v3501_v17  ;;  %v1499_v23 = vmul.f32 %v3794_v61, %v1466_v60  ;;  %v4814_v34 = vld [vmem:[#allocation25_spill] sm:$0xff] }
 0x200   : > { %v3874_v1 = vadd.f32 %v1498_v47, %v3507_v32  ;;  %1611 = vperm.xlu1 %2523, %v3512_v18   ;;  %1615 = vperm.xlu2 %2521, %v4811_v45  }
 0x201   : > { %v3879_v33 = vadd.f32 %v1499_v23, %v3570_v37  ;;  %1667 = vperm.xlu0 %2522, %v3575_v38   ;;  %v1305_v43 = vpop.permute.xlu1 %1304  ;;  %v1341_v62 = vpop.permute.xlu2 %1340 }
 0x202   : > { %v1426_v31 = vadd.f32 %v3767_v6, %v1305_v43  ;;  %v1435_v17 = vadd.f32 %v3767_v6, %v1341_v62  ;;  %v1345_v56 = vpop.permute.xlu0 %1344 }
 0x203   : > { %v1436_v3 = vadd.f32 %v3767_v6, %v1345_v56 }
 0x204   : > { %v1459_v32 = vmin.f32 %v1426_v31, 0.0  ;;  %v1468_v11 = vmin.f32 %v1435_v17, 0.0 }
 0x205   : > { %v1469_v44 = vmin.f32 %v1436_v3, 0.0 }
 0x206   : > { %v1492_v18 = vmul.f32 %v3794_v61, %v1459_v32  ;;  %v1501_v10 = vmul.f32 %v3794_v61, %v1468_v11 }
 0x207   : > { %v1502_v37 = vmul.f32 %v3794_v61, %v1469_v44 }
 0x208   : > { %v3889_v38 = vadd.f32 %v1492_v18, %v3548_v63  ;;  %v3892_v15 = vadd.f32 %v1501_v10, %v4812_v24  ;;  %1623 = vperm.xlu1 %2523, %v4813_v5   ;;  %1627 = vperm.xlu2 %2521, %v4814_v34  }
 0x209   : > { %v3897_v60 = vadd.f32 %v1502_v37, %v3609_v29  ;;  %1679 = vperm.xlu0 %2522, %v3614_v9   ;;  %v1313_v47 = vpop.permute.xlu1 %1312  ;;  %v1353_v23 = vpop.permute.xlu2 %1352 }
 0x20a   : > { %v1428_v45 = vadd.f32 %v3767_v6, %v1313_v47  ;;  %v1438_v43 = vadd.f32 %v3767_v6, %v1353_v23  ;;  %v1357_v63 = vpop.permute.xlu0 %1356  ;;  %v4815_v23 = vld [vmem:[#allocation31_spill] sm:$0xff] }
 0x20b   : > { %v1439_v62 = vadd.f32 %v3767_v6, %v1357_v63  ;;  %v4817_v63 = vld [vmem:[#allocation14_spill] sm:$0xff] }
 0x20c   : > { %v1461_v31 = vmin.f32 %v1428_v45, 0.0  ;;  %v1471_v17 = vmin.f32 %v1438_v43, 0.0  ;;  %v4816_v43 = vld [vmem:[#allocation9_spill] sm:$0xff] }
 0x20d   : > { %v1472_v56 = vmin.f32 %v1439_v62, 0.0  ;;  %v1554_v62 = vld [vmem:[%s2772_s13] sm:$0xff] }
 0x20e   : > { %v1494_v3 = vmul.f32 %v3794_v61, %v1461_v31  ;;  %v1504_v32 = vmul.f32 %v3794_v61, %v1471_v17  ;;  %vm1562_vm0 = vnez %v1554_v62 }
 0x20f   : > { %v1505_v29 = vmul.f32 %v3794_v61, %v1472_v56 }
 0x210   : > { %v3907_v9 = vadd.f32 %v1494_v3, %v3590_v27  ;;  %v3910_v11 = vadd.f32 %v1504_v32, %v3592_v49  ;;  %1635 = vperm.xlu1 %2523, %v3597_v21   ;;  %1639 = vperm.xlu2 %2521, %v3603_v41  }
 0x211   : > { %v3915_v44 = vadd.f32 %v1505_v29, %v3650_v52  ;;  %1691 = vperm.xlu0 %2522, %v3655_v51   ;;  %v1325_v18 = vpop.permute.xlu1 %1324  ;;  %v1365_v10 = vpop.permute.xlu2 %1364 }
 0x212   : > { %v1431_v37 = vadd.f32 %v3767_v6, %v1325_v18  ;;  %v1441_v27 = vadd.f32 %v3767_v6, %v1365_v10  ;;  %v1369_v24 = vpop.permute.xlu0 %1368 }
 0x213   : > { %v1442_v49 = vadd.f32 %v3767_v6, %v1369_v24 }
 0x214   : > { %v1464_v5 = vmin.f32 %v1431_v37, 0.0  ;;  %v1474_v34 = vmin.f32 %v1441_v27, 0.0 }
 0x215   : > { %v1475_v21 = vmin.f32 %v1442_v49, 0.0  ;;  %v4818_v49 = vmov 0  }
 0x216   : > { %v1497_v41 = vmul.f32 %v3794_v61, %v1464_v5  ;;  %v1507_v52 = vmul.f32 %v3794_v61, %v1474_v34 }
 0x217   : > { %v1508_v47 = vmul.f32 %v3794_v61, %v1475_v21 }
 0x218   : > { %v3925_v51 = vadd.f32 %v1497_v41, %v3629_v7  ;;  %v3928_v45 = vadd.f32 %v1507_v52, %v4815_v23  ;;  %1647 = vperm.xlu1 %2523, %v4816_v43   ;;  %1651 = vperm.xlu2 %2521, %v4817_v63  }
 0x219   : > { %v3934_v31 = vadd.f32 %v1508_v47, %v3689_v42  ;;  %v1337_v17 = vpop.permute.xlu1 %1336  ;;  %v1377_v56 = vpop.permute.xlu2 %1376  ;;  %v3942_v42 = vsel %vm1562_vm0, 16843009, %v4818_v49 }
 0x21a   : > { %v1434_v3 = vadd.f32 %v3767_v6, %v1337_v17  ;;  %v1444_v32 = vadd.f32 %v3767_v6, %v1377_v56  ;;  %v1381_v29 = vpop.permute.xlu0 %1380  ;;  %v1706_v23 = vunpack.c.0.s8 %v3942_v42 }
 0x21b   : > { %v1445_v7 = vadd.f32 %v3767_v6, %v1381_v29 }
 0x21c   : > { %v1467_v18 = vmin.f32 %v1434_v3, 0.0  ;;  %v1477_v10 = vmin.f32 %v1444_v32, 0.0 }
 0x21d   : > { %v1478_v37 = vmin.f32 %v1445_v7, 0.0 }
 0x21e   : > { %v1500_v27 = vmul.f32 %v3794_v61, %v1467_v18  ;;  %v1510_v24 = vmul.f32 %v3794_v61, %v1477_v10 }
 0x21f   : > { %v1511_v5 = vmul.f32 %v3794_v61, %v1478_v37 }
 0x220   : > { %v3946_v34 = vadd.f32 %v1500_v27, %v3669_v55  ;;  %v3949_v21 = vadd.f32 %v1510_v24, %v3672_v2  ;;  %1659 = vperm.xlu1 %2523, %v3677_v30   ;;  %1663 = vperm.xlu2 %2521, %v3683_v26   ;;  %v1738_v30 = vpack.c.b16 %v1706_v23, %v1706_v23 }
 0x221   : > { %v3954_v41 = vadd.f32 %v1511_v5, %v3723_v8  ;;  %v1349_v52 = vpop.permute.xlu1 %1348  ;;  %v1389_v47 = vpop.permute.xlu2 %1388 }
 0x222   : > { %v1437_v43 = vadd.f32 %v3767_v6, %v1349_v52  ;;  %v1447_v63 = vadd.f32 %v3767_v6, %v1389_v47  ;;  %v1393_v55 = vpop.permute.xlu0 %1392  ;;  %v1739_v37 = vpack.c.b8 %v1738_v30, %v1738_v30  ;;  %v1555_v52 = vld [vmem:[%s2772_s13 + $0x8] sm:$0xff] }
 0x223   : > { %v1448_v62 = vadd.f32 %v3767_v6, %v1393_v55  ;;  %vm1563_vm2 = vnez %v1555_v52 }
 0x224   : > { %v1470_v2 = vmin.f32 %v1437_v43, 0.0  ;;  %v1480_v17 = vmin.f32 %v1447_v63, 0.0  ;;  %vm1802_vm1 = vnez %v1739_v37  ;;  %v3995_v30 = vsel %vm1563_vm2, 16843009, %v4818_v49 }
 0x225   : > { %v1481_v56 = vmin.f32 %v1448_v62, 0.0 }
 0x226   : > { %v1503_v26 = vmul.f32 %v3794_v61, %v1470_v2  ;;  %v1513_v8 = vmul.f32 %v3794_v61, %v1480_v17 }
 0x227   : > { %v1514_v3 = vmul.f32 %v3794_v61, %v1481_v56  ;;  %v1834_v56 = vsel %vm1802_vm1, 16843009, %v4818_v49 }
 0x228   : > { %v3964_v32 = vadd.f32 %v1503_v26, %v3705_v14  ;;  %v3967_v29 = vadd.f32 %v1513_v8, %v3708_v46  ;;  %1671 = vperm.xlu1 %2523, %v3713_v54   ;;  %1675 = vperm.xlu2 %2521, %v3719_v13   ;;  %v1556_v46 = vld [vmem:[%s2772_s13 + $0x10] sm:$0xff] }
 0x229   : > { %v3972_v7 = vadd.f32 %v1514_v3, %v3755_v22  ;;  %v1361_v18 = vpop.permute.xlu1 %1360  ;;  %v1401_v10 = vpop.permute.xlu2 %1400  ;;  %vm1564_vm3 = vnez %v1556_v46 }
 0x22a   : > { %v1440_v27 = vadd.f32 %v3767_v6, %v1361_v18  ;;  %v1450_v24 = vadd.f32 %v3767_v6, %v1401_v10  ;;  %v1405_v5 = vpop.permute.xlu0 %1404  ;;  %v1866_v10 = vunpack.c.0.s8 %v1834_v56 }
 0x22b   : > { %v1451_v14 = vadd.f32 %v3767_v6, %v1405_v5 }
 0x22c   : > { %v1473_v47 = vmin.f32 %v1440_v27, 0.0  ;;  %v1483_v23 = vmin.f32 %v1450_v24, 0.0  ;;  %vm1898_vm4 = vcmp.ne.s32.totalorder %v1866_v10, 0 }
 0x22d   : > { %v1484_v54 = vmin.f32 %v1451_v14, 0.0 }
 0x22e   : > { %v1506_v13 = vmul.f32 %v3794_v61, %v1473_v47  ;;  %v1516_v22 = vmul.f32 %v3794_v61, %v1483_v23 }
 0x22f   : > { %v1517_v43 = vmul.f32 %v3794_v61, %v1484_v54 }
 0x230   : > { %v3983_v63 = vadd.f32 %v1506_v13, %v3737_v16  ;;  %v3986_v55 = vadd.f32 %v1516_v22, %v3740_v35  ;;  %1683 = vperm.xlu1 %2523, %v3745_v57   ;;  %1687 = vperm.xlu2 %2521, %v3751_v58   ;;  %v3998_v16 = vsel %vm1564_vm3, 16843009, %v4818_v49  ;;  %v1707_v58 = vunpack.c.1.s8 %v3942_v42 }
 0x231   : > { %v3991_v62 = vadd.f32 %v1517_v43, %v3783_v20  ;;  %v1373_v2 = vpop.permute.xlu1 %1372  ;;  %v1413_v17 = vpop.permute.xlu2 %1412  ;;  %v1711_v20 = vunpack.c.1.s8 %v3995_v30  ;;  %v1715_v37 = vunpack.c.1.s8 %v3998_v16 }
 0x232   : > { %v1443_v35 = vadd.f32 %v3767_v6, %v1373_v2  ;;  %v1453_v26 = vadd.f32 %v3767_v6, %v1413_v17  ;;  %v1417_v57 = vpop.permute.xlu0 %1416  ;;  %v1740_v14 = vpack.c.b16 %v1707_v58, %v1707_v58 }
 0x233   : > { %v1454_v8 = vadd.f32 %v3767_v6, %v1417_v57  ;;  %v1748_v52 = vpack.c.b16 %v1711_v20, %v1711_v20  ;;  %v1756_v54 = vpack.c.b16 %v1715_v37, %v1715_v37  ;;  %v1712_v20 = vunpack.c.2.s8 %v3995_v30 }
 0x234   : > { %v1476_v3 = vmin.f32 %v1443_v35, 0.0  ;;  %v1486_v18 = vmin.f32 %v1453_v26, 0.0  ;;  %v1741_v17 = vpack.c.b8 %v1740_v14, %v1740_v14 }
 0x235   : > { %v1487_v27 = vmin.f32 %v1454_v8, 0.0  ;;  %v1749_v56 = vpack.c.b8 %v1748_v52, %v1748_v52  ;;  %v1750_v14 = vpack.c.b16 %v1712_v20, %v1712_v20 }
 0x236   : > { %v1509_v24 = vmul.f32 %v3794_v61, %v1476_v3  ;;  %v1519_v5 = vmul.f32 %v3794_v61, %v1486_v18  ;;  %vm1803_vm5 = vnez %v1741_v17  ;;  %v1708_v18 = vunpack.c.2.s8 %v3942_v42 }
 0x237   : > { %v1520_v46 = vmul.f32 %v3794_v61, %v1487_v27  ;;  %vm1807_vm6 = vnez %v1749_v56  ;;  %v1835_v57 = vsel %vm1803_vm5, 16843009, %v4818_v49 }
 0x238   : > { %v4010_v47 = vadd.f32 %v1509_v24, %v3770_v48  ;;  %v4013_v23 = vadd.f32 %v1519_v5, %v3773_v39  ;;  %1695 = vperm.xlu1 %2523, %v3778_v12   ;;  %v1757_v39 = vpack.c.b8 %v1756_v54, %v1756_v54  ;;  %v1867_v27 = vunpack.c.0.s8 %v1835_v57 }
 0x239   : > { %v4017_v13 = vadd.f32 %v1520_v46, %v3804_v40  ;;  %v1385_v22 = vpop.permute.xlu1 %1384  ;;  %v1742_v54 = vpack.c.b16 %v1708_v18, %v1708_v18  ;;  %v1714_v18 = vunpack.c.0.s8 %v3998_v16 }
 0x23a   : > { %v1446_v43 = vadd.f32 %v3767_v6, %v1385_v22  ;;  %v1572_v2 = vpop.permute.xlu2 %1571  ;;  %vm1811_vm7 = vnez %v1757_v39  ;;  %vm1899_vm9 = vcmp.ne.s32.totalorder %v1867_v27, 0 }
 0x23b   : > { %v4021_v35 = vsel %vm1898_vm4, %v3807_v19, %v1572_v2  ;;  %v1576_v48 = vpop.permute.xlu0 %1575  ;;  %v1839_v19 = vsel %vm1807_vm6, 16843009, %v4818_v49  ;;  %v1843_v37 = vsel %vm1811_vm7, 16843009, %v4818_v49  ;;  %v1743_v39 = vpack.c.b8 %v1742_v54, %v1742_v54 }
 0x23c   : > { %v1479_v26 = vmin.f32 %v1446_v43, 0.0  ;;  %v1871_v5 = vunpack.c.0.s8 %v1839_v19  ;;  %v1875_v46 = vunpack.c.0.s8 %v1843_v37  ;;  %v1751_v43 = vpack.c.b8 %v1750_v14, %v1750_v14 }
 0x23d   : > { %v4048_v57 = vsel %vm1899_vm9, %v3837_v36, %v1576_v48  ;;  %vm1804_vm13 = vnez %v1743_v39 }
 0x23e   : > { %v1512_v12 = vmul.f32 %v3794_v61, %v1479_v26  ;;  %vm1903_vm10 = vcmp.ne.s32.totalorder %v1871_v5, 0  ;;  %vm1907_vm11 = vcmp.ne.s32.totalorder %v1875_v46, 0  ;;  %vm1808_vm12 = vnez %v1751_v43 }
 0x23f   : > { %v1840_v27 = vsel %vm1808_vm12, 16843009, %v4818_v49  ;;  %v1754_v5 = vpack.c.b16 %v1714_v18, %v1714_v18  ;;  %v1836_v46 = vsel %vm1804_vm13, 16843009, %v4818_v49 }
 0x240   : > { %v4025_v40 = vadd.f32 %v1512_v12, %v3800_v50  ;;  %v1557_v50 = vld [vmem:[%s2772_s13 + $0x18] sm:$0xff]  ;;  %v1710_v12 = vunpack.c.0.s8 %v3995_v30 }
 0x241   : > { %v1397_v58 = vpop.permute.xlu1 %1396  ;;  %vm1565_vm8 = vnez %v1557_v50 }
 0x242   : > { %v1449_v8 = vadd.f32 %v3767_v6, %v1397_v58  ;;  %v4031_v3 = vpop.permute.xlu2 %1583  ;;  %v4043_v17 = vsel %vm1565_vm8, 16843009, %v4818_v49  ;;  %v1709_v58 = vunpack.c.3.s8 %v3942_v42 }
 0x243   : > { %v4034_v10 = vpop.permute.xlu0 %1595  ;;  %v1718_v50 = vunpack.c.0.s8 %v4043_v17  ;;  %v1721_v18 = vunpack.c.3.s8 %v4043_v17 }
 0x244   : > { %v1482_v24 = vmin.f32 %v1449_v8, 0.0  ;;  %v1744_v48 = vpack.c.b16 %v1709_v58, %v1709_v58 }
 0x246   : > { %v1515_v52 = vmul.f32 %v3794_v61, %v1482_v24 }
 0x248   : > { %v4040_v22 = vadd.f32 %v1515_v52, %v3824_v53  ;;  %v1762_v52 = vpack.c.b16 %v1718_v50, %v1718_v50 }
 0x249   : > { %v1409_v2 = vpop.permute.xlu1 %1408 }
 0x24a   : > { %v1452_v56 = vadd.f32 %v3767_v6, %v1409_v2  ;;  %v1592_v26 = vpop.permute.xlu2 %1591  ;;  %v1713_v2 = vunpack.c.3.s8 %v3995_v30 }
 0x24b   : > { %v4052_v53 = vsel %vm1903_vm10, %v3852_v25, %v1592_v26  ;;  %v1608_v20 = vpop.permute.xlu0 %1607  ;;  %v1746_v25 = vpack.c.b16 %v1710_v12, %v1710_v12  ;;  %v1872_v26 = vunpack.c.0.s8 %v1840_v27  ;;  %v1755_v12 = vpack.c.b8 %v1754_v5, %v1754_v5 }
 0x24c   : > { %v1485_v19 = vmin.f32 %v1452_v56, 0.0  ;;  %v1963_v8 = vmax.f32 %v4048_v57, %v4052_v53  ;;  %v4058_v37 = vsel %vm1907_vm11, %v3879_v33, %v1608_v20  ;;  %v1717_v33 = vunpack.c.3.s8 %v3998_v16 }
 0x24d   : > { %v1747_v43 = vpack.c.b8 %v1746_v25, %v1746_v25  ;;  %v1745_v56 = vpack.c.b8 %v1744_v48, %v1744_v48  ;;  %vm4082_vm0 = vcmp.ne.s32.totalorder %v1872_v26, 0  ;;  %vm1810_vm2 = vnez %v1755_v12 }
 0x24e   : > { %v1518_v36 = vmul.f32 %v3794_v61, %v1485_v19  ;;  %v4063_v42 = vmax.f32 %v1963_v8, %v4058_v37  ;;  %v1760_v20 = vpack.c.b16 %v1717_v33, %v1717_v33  ;;  %v1558_v19 = vld [vmem:[%s2772_s13 + $0x20] sm:$0xff]  ;;  %v1763_v8 = vpack.c.b8 %v1762_v52, %v1762_v52 }
 0x24f   : > { %vm1806_vm14 = vnez %v1747_v43  ;;  %vm4078_vm15 = vnez %v1745_v56  ;;  %vm1566_vm1 = vnez %v1558_v19  ;;  %v1720_v33 = vunpack.c.2.s8 %v4043_v17 }
 0x250   : > { %v4067_v24 = vadd.f32 %v1518_v36, %v3848_v4  ;;  %v1868_v4 = vunpack.c.0.s8 %v1836_v46  ;;  %v1752_v36 = vpack.c.b16 %v1713_v2, %v1713_v2  ;;  %v1761_v27 = vpack.c.b8 %v1760_v20, %v1760_v20 }
 0x251   : > { %v1421_v14 = vpop.permute.xlu1 %1420  ;;  %vm1814_vm4 = vnez %v1763_v8  ;;  %v1838_v5 = vsel %vm1806_vm14, 16843009, %v4818_v49  ;;  %v4092_v52 = vsel %vm1566_vm1, 16843009, %v4818_v49  ;;  %v1716_v43 = vunpack.c.2.s8 %v3998_v16 }
 0x252   : > { %v1455_v54 = vadd.f32 %v3767_v6, %v1421_v14  ;;  %v4073_v58 = vpop.permute.xlu2 %1603  ;;  %vm1900_vm3 = vcmp.ne.s32.totalorder %v1868_v4, 0  ;;  %v1753_v46 = vpack.c.b8 %v1752_v36, %v1752_v36  ;;  %v4103_v2 = vsel %vm4082_vm0, %v3861_v0, %v4034_v10 }
 0x253   : > { %v1620_v48 = vpop.permute.xlu0 %1619  ;;  %v1842_v56 = vsel %vm1810_vm2, 16843009, %v4818_v49  ;;  %vm1813_vm5 = vnez %v1761_v27  ;;  %v1870_v12 = vunpack.c.0.s8 %v1838_v5  ;;  %v1766_v20 = vpack.c.b16 %v1720_v33, %v1720_v33 }
 0x254   : > { %v1488_v39 = vmin.f32 %v1455_v54, 0.0  ;;  %v1559_v54 = vld [vmem:[%s2772_s13 + $0x28] sm:$0xff]  ;;  %v1724_v19 = vunpack.c.2.s8 %v4092_v52  ;;  %v1874_v8 = vunpack.c.0.s8 %v1842_v56  ;;  %vm1809_vm7 = vnez %v1753_v46 }
 0x255   : > { %vm1567_vm6 = vnez %v1559_v54  ;;  %v1758_v10 = vpack.c.b16 %v1716_v43, %v1716_v43  ;;  %vm1902_vm8 = vcmp.ne.s32.totalorder %v1870_v12, 0  ;;  %v1767_v30 = vpack.c.b8 %v1766_v20, %v1766_v20  ;;  %v1560_v54 = vld [vmem:[%s2772_s13 + $0x30] sm:$0xff] }
 0x256   : > { %v1521_v50 = vmul.f32 %v3794_v61, %v1488_v39  ;;  %v1768_v61 = vpack.c.b16 %v1721_v18, %v1721_v18  ;;  %v1846_v39 = vsel %vm1814_vm4, 16843009, %v4818_v49  ;;  %v4115_v36 = vsel %vm1567_vm6, 16843009, %v4818_v49 }
 0x257   : > { %v1774_v27 = vpack.c.b16 %v1724_v19, %v1724_v19  ;;  %vm1906_vm10 = vcmp.ne.s32.totalorder %v1874_v8, 0  ;;  %v1759_v46 = vpack.c.b8 %v1758_v10, %v1758_v10  ;;  %v1719_v43 = vunpack.c.1.s8 %v4043_v17 }
 0x258   : > { %v4087_v25 = vadd.f32 %v1521_v50, %v3870_v28  ;;  %v1837_v28 = vsel %vm4078_vm15, 16843009, %v4818_v49  ;;  %v1769_v4 = vpack.c.b8 %v1768_v61, %v1768_v61  ;;  %v1845_v50 = vsel %vm1813_vm5, 16843009, %v4818_v49 }
 0x259   : > { %v1869_v18 = vunpack.c.0.s8 %v1837_v28  ;;  %v1841_v61 = vsel %vm1809_vm7, 16843009, %v4818_v49  ;;  %v1877_v12 = vunpack.c.0.s8 %v1845_v50  ;;  %v4140_v17 = vsel %vm1906_vm10, %v3874_v1, %v4073_v58 }
 0x25a   : > { %v1580_v14 = vpop.permute.xlu1 %1579  ;;  %v1616_v0 = vpop.permute.xlu2 %1615  ;;  %vm4117_vm9 = vnez %v1769_v4  ;;  %v1873_v19 = vunpack.c.0.s8 %v1841_v61  ;;  %vm4142_vm13 = vnez %v1767_v30  ;;  %vm1568_vm14 = vnez %v1560_v54 }
 0x25b   : > { %v4107_v26 = vsel %vm1900_vm3, %v3889_v38, %v1580_v14  ;;  %v1878_v38 = vunpack.c.0.s8 %v1846_v39  ;;  %v1632_v5 = vpop.permute.xlu0 %1631  ;;  %v1723_v14 = vunpack.c.1.s8 %v4092_v52  ;;  %vm4125_vm11 = vcmp.ne.s32.totalorder %v1869_v18, 0 }
 0x25c   : > { %v1964_v16 = vmax.f32 %v4107_v26, %v4103_v2  ;;  %v1727_v39 = vunpack.c.1.s8 %v4115_v36  ;;  %v1849_v4 = vsel %vm4117_vm9, 16843009, %v4818_v49  ;;  %vm1812_vm15 = vnez %v1759_v46 }
 0x25d   : > { %vm1910_vm12 = vcmp.ne.s32.totalorder %v1878_v38, 0  ;;  %v1772_v18 = vpack.c.b16 %v1723_v14, %v1723_v14  ;;  %v1764_v38 = vpack.c.b16 %v1719_v43, %v1719_v43  ;;  %v1881_v61 = vunpack.c.0.s8 %v1849_v4 }
 0x25e   : > { %v4150_v50 = vsel %vm1910_vm12, %v3897_v60, %v1620_v48  ;;  %v1780_v6 = vpack.c.b16 %v1727_v39, %v1727_v39  ;;  %vm1905_vm0 = vcmp.ne.s32.totalorder %v1873_v19, 0  ;;  %v4153_v1 = vsel %vm1568_vm14, 16843009, %v4818_v49 }
 0x25f   : > { %v4161_v30 = vsel %vm4125_vm11, %v3828_v59, %v4031_v3  ;;  %vm4163_vm1 = vcmp.ne.s32.totalorder %v1877_v12, 0  ;;  %v1848_v60 = vsel %vm4142_vm13, 16843009, %v4818_v49  ;;  %v1844_v48 = vsel %vm1812_vm15, 16843009, %v4818_v49 }
 0x260   : > { %v1773_v46 = vpack.c.b8 %v1772_v18, %v1772_v18  ;;  %v1765_v54 = vpack.c.b8 %v1764_v38, %v1764_v38  ;;  %v1722_v43 = vunpack.c.0.s8 %v4092_v52  ;;  %v1781_v59 = vpack.c.b8 %v1780_v6, %v1780_v6 }
 0x261   : > { %v1726_v3 = vunpack.c.0.s8 %v4115_v36  ;;  %v1730_v39 = vunpack.c.0.s8 %v4153_v1  ;;  %vm1913_vm3 = vcmp.ne.s32.totalorder %v1881_v61, 0  ;;  %v4182_v19 = vsel %vm4163_vm1, %v3892_v15, %v1616_v0 }
 0x262   : > { %v1588_v33 = vpop.permute.xlu1 %1587  ;;  %v1880_v8 = vunpack.c.0.s8 %v1848_v60  ;;  %vm1819_vm4 = vnez %v1773_v46  ;;  %vm1815_vm5 = vnez %v1765_v54  ;;  %v1770_v18 = vpack.c.b16 %v1722_v43, %v1722_v43 }
 0x263   : > { %v4130_v56 = vsel %vm1902_vm8, %v3907_v9, %v1588_v33  ;;  %v1775_v9 = vpack.c.b8 %v1774_v27, %v1774_v27  ;;  %v1628_v33 = vpop.permute.xlu2 %1627  ;;  %v1644_v12 = vpop.permute.xlu0 %1643  ;;  %v4189_v38 = vsel %vm1913_vm3, %v3915_v44, %v1632_v5  ;;  %vm1823_vm6 = vnez %v1781_v59 }
 0x264   : > { %v1962_v20 = vmax.f32 %v4021_v35, %v4130_v56  ;;  %v1778_v6 = vpack.c.b16 %v1726_v3, %v1726_v3  ;;  %v1786_v61 = vpack.c.b16 %v1730_v39, %v1730_v39  ;;  %vm4193_vm8 = vcmp.ne.s32.totalorder %v1880_v8, 0 }
 0x265   : > { %vm1820_vm2 = vnez %v1775_v9  ;;  %v1847_v27 = vsel %vm1815_vm5, 16843009, %v4818_v49  ;;  %v1851_v60 = vsel %vm1819_vm4, 16843009, %v4818_v49  ;;  %v1855_v44 = vsel %vm1823_vm6, 16843009, %v4818_v49 }
 0x266   : > { %v4147_v10 = vmax.f32 %v1962_v20, %v4140_v17  ;;  %v1876_v20 = vunpack.c.0.s8 %v1844_v48  ;;  %v1771_v46 = vpack.c.b8 %v1770_v18, %v1770_v18  ;;  %v1725_v54 = vunpack.c.3.s8 %v4092_v52 }
 0x267   : > { %v1779_v59 = vpack.c.b8 %v1778_v6, %v1778_v6  ;;  %v1787_v3 = vpack.c.b8 %v1786_v61, %v1786_v61  ;;  %v1729_v39 = vunpack.c.3.s8 %v4115_v36  ;;  %v1733_v8 = vunpack.c.3.s8 %v4153_v1 }
 0x268   : > { %v1970_v58 = vmax.f32 %v4147_v10, %v4150_v50  ;;  %vm1908_vm7 = vcmp.ne.s32.totalorder %v1876_v20, 0  ;;  %v1879_v20 = vunpack.c.0.s8 %v1847_v27  ;;  %v4213_v52 = vsel %vm4193_vm8, %v3910_v11, %v1628_v33 }
 0x269   : > { %v1887_v18 = vunpack.c.0.s8 %v1855_v44  ;;  %vm1818_vm10 = vnez %v1771_v46  ;;  %vm1822_vm11 = vnez %v1779_v59  ;;  %vm1826_vm12 = vnez %v1787_v3 }
 0x26a   : > { %v1600_v14 = vpop.permute.xlu1 %1599  ;;  %vm1911_vm13 = vcmp.ne.s32.totalorder %v1879_v20, 0  ;;  %v1792_v27 = vpack.c.b16 %v1733_v8, %v1733_v8  ;;  %v1850_v0 = vsel %vm1818_vm10, 16843009, %v4818_v49  ;;  %v1728_v46 = vunpack.c.2.s8 %v4115_v36 }
 0x26b   : > { %v4173_v28 = vsel %vm1905_vm0, %v3925_v51, %v1600_v14  ;;  %v1852_v51 = vsel %vm1820_vm2, 16843009, %v4818_v49  ;;  %v1640_v14 = vpop.permute.xlu2 %1639  ;;  %v1656_v6 = vpop.permute.xlu0 %1655  ;;  %vm4228_vm0 = vcmp.ne.s32.totalorder %v1887_v18, 0 }
 0x26c   : > { %v1965_v4 = vmax.f32 %v4161_v30, %v4173_v28  ;;  %v1884_v48 = vunpack.c.0.s8 %v1852_v51  ;;  %v1561_v51 = vld [vmem:[%s2772_s13 + $0x38] sm:$0xff]  ;;  %v1793_v8 = vpack.c.b8 %v1792_v27, %v1792_v27  ;;  %s2456_s13 = sshll.u32 %s253_s11, 8  ;;  %s2462_s11 = sshll.u32 (%p2737_p5), %s2718_s18, 3 }
 0x26d   : > { %vm1569_vm14 = vnez %v1561_v51  ;;  %v1732_v51 = vunpack.c.2.s8 %v4153_v1  ;;  %s4538_s15 = scalar_lea.vmem [#allocation5], %s2456_s13  ;;  %s4596_s14 = scalar_lea.vmem (%p2737_p5), %s4674_s4, %s2462_s11 }
 0x26e   : > { %v4186_v9 = vmax.f32 %v1965_v4, %v4182_v19  ;;  %vm1916_vm9 = vcmp.ne.s32.totalorder %v1884_v48, 0  ;;  %v1776_v48 = vpack.c.b16 %v1725_v54, %v1725_v54  ;;  %v1858_v54 = vsel %vm1826_vm12, 16843009, %v4818_v49 }
 0x26f   : > { %vm1829_vm3 = vnez %v1793_v8 }
 0x270   : > { %v1973_v15 = vmax.f32 %v4186_v9, %v4189_v38  ;;  %v1777_v44 = vpack.c.b8 %v1776_v48, %v1776_v48  ;;  %v1782_v48 = vpack.c.b16 %v1728_v46, %v1728_v46 }
 0x272   : > { %v1612_v5 = vpop.permute.xlu1 %1611  ;;  %vm1821_vm1 = vnez %v1777_v44  ;;  %v1783_v44 = vpack.c.b8 %v1782_v48, %v1782_v48 }
 0x273   : > { %v4202_v43 = vsel %vm1908_vm7, %v3946_v34, %v1612_v5  ;;  %v1883_v34 = vunpack.c.0.s8 %v1851_v60  ;;  %v4218_v5 = vsel %vm1916_vm9, %v3934_v31, %v1644_v12  ;;  %v1854_v31 = vsel %vm1822_vm11, 16843009, %v4818_v49  ;;  %v1668_v27 = vpop.permute.xlu0 %1667 }
 0x274   : > { %v1968_v4 = vmax.f32 %v1964_v16, %v4202_v43  ;;  %v1784_v16 = vpack.c.b16 %v1729_v39, %v1729_v39  ;;  %v4239_v39 = vsel %vm1569_vm14, 16843009, %v4818_v49  ;;  %v1886_v18 = vunpack.c.0.s8 %v1854_v31 }
 0x275   : > { %vm4223_vm15 = vcmp.ne.s32.totalorder %v1883_v34, 0  ;;  %v1882_v34 = vunpack.c.0.s8 %v1850_v0  ;;  %v1853_v33 = vsel %vm1821_vm1, 16843009, %v4818_v49  ;;  %vm1824_vm7 = vnez %v1783_v44 }
 0x276   : > { %v1972_v61 = vmax.f32 %v1968_v4, %v4213_v52  ;;  %v1785_v3 = vpack.c.b8 %v1784_v16, %v1784_v16  ;;  %v1652_v4 = vpop.permute.xlu2 %1651  ;;  %v4247_v36 = vsel %vm4223_vm15, %v3928_v45, %v1640_v14  ;;  %v1890_v16 = vunpack.c.0.s8 %v1858_v54 }
 0x277   : > { %vm1914_vm4 = vcmp.ne.s32.totalorder %v1882_v34, 0  ;;  %v1790_v45 = vpack.c.b16 %v1732_v51, %v1732_v51  ;;  %vm1918_vm5 = vcmp.ne.s32.totalorder %v1886_v18, 0 }
 0x278   : > { %v4221_v11 = vmax.f32 %v1972_v61, %v4218_v5  ;;  %v1736_v61 = vunpack.c.2.s8 %v4239_v39  ;;  %vm1825_vm2 = vnez %v1785_v3  ;;  %vm1922_vm6 = vcmp.ne.s32.totalorder %v1890_v16, 0 }
 0x279   : > { %v1857_v0 = vsel %vm1825_vm2, 16843009, %v4818_v49  ;;  %v1791_v54 = vpack.c.b8 %v1790_v45, %v1790_v45  ;;  %v1885_v3 = vunpack.c.0.s8 %v1853_v33  ;;  %v4273_v8 = vsel %vm1918_vm5, %v3949_v21, %v1652_v4 }
 0x27a   : > { %v1624_v12 = vpop.permute.xlu1 %1623  ;;  %v1889_v34 = vunpack.c.0.s8 %v1857_v0  ;;  %v1856_v21 = vsel %vm1824_vm7, 16843009, %v4818_v49  ;;  %v1734_v33 = vunpack.c.0.s8 %v4239_v39 }
 0x27b   : > { %v4236_v59 = vsel %vm1911_vm13, %v3964_v32, %v1624_v12  ;;  %v1798_v12 = vpack.c.b16 %v1736_v61, %v1736_v61  ;;  %v4277_v61 = vsel %vm1922_vm6, %v3972_v7, %v1668_v27  ;;  %vm1828_vm8 = vnez %v1791_v54  ;;  %v1680_v4 = vpop.permute.xlu0 %1679 }
 0x27c   : > { %v1971_v20 = vmax.f32 %v4063_v42, %v4236_v59  ;;  %v4256_v42 = vsel %vm4228_vm0, %v3954_v41, %v1656_v6  ;;  %v1731_v41 = vunpack.c.1.s8 %v4153_v1  ;;  %v1861_v6 = vsel %vm1829_vm3, 16843009, %v4818_v49 }
 0x27d   : > { %v1799_v18 = vpack.c.b8 %v1798_v12, %v1798_v12  ;;  %v1893_v48 = vunpack.c.0.s8 %v1861_v6  ;;  %vm1917_vm9 = vcmp.ne.s32.totalorder %v1885_v3, 0  ;;  %vm1921_vm10 = vcmp.ne.s32.totalorder %v1889_v34, 0 }
 0x27e   : > { %v4250_v32 = vmax.f32 %v1971_v20, %v4247_v36  ;;  %v1735_v20 = vunpack.c.1.s8 %v4239_v39  ;;  %v1664_v1 = vpop.permute.xlu2 %1663  ;;  %v1860_v0 = vsel %vm1828_vm8, 16843009, %v4818_v49  ;;  %v1888_v12 = vunpack.c.0.s8 %v1856_v21 }
 0x27f   : > { %vm1832_vm11 = vnez %v1799_v18  ;;  %vm1925_vm12 = vcmp.ne.s32.totalorder %v1893_v48, 0  ;;  %v4293_v44 = vsel %vm1921_vm10, %v3967_v29, %v1664_v1  ;;  %v1892_v6 = vunpack.c.0.s8 %v1860_v0 }
 0x280   : > { %v1979_v14 = vmax.f32 %v4250_v32, %v4256_v42  ;;  %v1796_v10 = vpack.c.b16 %v1735_v20, %v1735_v20  ;;  %v1794_v54 = vpack.c.b16 %v1734_v33, %v1734_v33  ;;  %vm1920_vm15 = vcmp.ne.s32.totalorder %v1888_v12, 0 }
 0x281   : > { %vm1924_vm0 = vcmp.ne.s32.totalorder %v1892_v6, 0  ;;  %v1737_v1 = vunpack.c.3.s8 %v4239_v39 }
 0x282   : > { %v1636_v31 = vpop.permute.xlu1 %1635  ;;  %v1795_v34 = vpack.c.b8 %v1794_v54, %v1794_v54 }
 0x283   : > { %v4265_v60 = vsel %vm1914_vm4, %v3983_v63, %v1636_v31  ;;  %v1788_v63 = vpack.c.b16 %v1731_v41, %v1731_v41  ;;  %v1797_v31 = vpack.c.b8 %v1796_v10, %v1796_v10  ;;  %v1864_v41 = vsel %vm1832_vm11, 16843009, %v4818_v49 }
 0x284   : > { %v1974_v46 = vmax.f32 %v1970_v58, %v4265_v60  ;;  %v1896_v20 = vunpack.c.0.s8 %v1864_v41  ;;  %vm1830_vm2 = vnez %v1795_v34 }
 0x285   : > { %v1789_v45 = vpack.c.b8 %v1788_v63, %v1788_v63  ;;  %vm1831_vm14 = vnez %v1797_v31 }
 0x286   : > { %v1978_v51 = vmax.f32 %v1974_v46, %v4273_v8  ;;  %v1676_v3 = vpop.permute.xlu2 %1675  ;;  %vm1928_vm1 = vcmp.ne.s32.totalorder %v1896_v20, 0 }
 0x287   : > { %vm1827_vm13 = vnez %v1789_v45  ;;  %v4310_v10 = vsel %vm1924_vm0, %v3986_v55, %v1676_v3  ;;  %v1862_v45 = vsel %vm1830_vm2, 16843009, %v4818_v49 }
 0x288   : > { %v4280_v58 = vmax.f32 %v1978_v51, %v4277_v61  ;;  %v1863_v51 = vsel %vm1831_vm14, 16843009, %v4818_v49  ;;  %v1894_v31 = vunpack.c.0.s8 %v1862_v45 }
 0x289   : > { %v1895_v21 = vunpack.c.0.s8 %v1863_v51 }
 0x28a   : > { %v1648_v16 = vpop.permute.xlu1 %1647  ;;  %vm1926_vm6 = vcmp.ne.s32.totalorder %v1894_v31, 0 }
 0x28b   : > { %v4286_v7 = vsel %vm1917_vm9, %v4010_v47, %v1648_v16  ;;  %v4298_v47 = vsel %vm1925_vm12, %v3991_v62, %v1680_v4  ;;  %v1692_v62 = vpop.permute.xlu0 %1691  ;;  %v1800_v16 = vpack.c.b16 %v1737_v1, %v1737_v1  ;;  %vm1927_vm4 = vcmp.ne.s32.totalorder %v1895_v21, 0 }
 0x28c   : > { %v1977_v27 = vmax.f32 %v1973_v15, %v4286_v7  ;;  %v1859_v15 = vsel %vm1827_vm13, 16843009, %v4818_v49  ;;  %v4314_v39 = vsel %vm1928_vm1, %v4017_v13, %v1692_v62 }
 0x28d   : > { %v1891_v48 = vunpack.c.0.s8 %v1859_v15  ;;  %v1801_v0 = vpack.c.b8 %v1800_v16, %v1800_v16 }
 0x28e   : > { %v1981_v46 = vmax.f32 %v1977_v27, %v4293_v44  ;;  %v1688_v33 = vpop.permute.xlu2 %1687 }
 0x28f   : > { %vm1923_vm3 = vcmp.ne.s32.totalorder %v1891_v48, 0  ;;  %v4326_v13 = vsel %vm1927_vm4, %v4013_v23, %v1688_v33  ;;  %vm1833_vm5 = vnez %v1801_v0 }
 0x290   : > { %v1985_v9 = vmax.f32 %v1981_v46, %v4298_v47  ;;  %v1865_v41 = vsel %vm1833_vm5, 16843009, %v4818_v49 }
 0x291   : > { %v1897_v54 = vunpack.c.0.s8 %v1865_v41 }
 0x292   : > { %v1660_v29 = vpop.permute.xlu1 %1659 }
 0x293   : > { %v4305_v18 = vsel %vm1920_vm15, %v4025_v40, %v1660_v29  ;;  %vm1929_vm7 = vcmp.ne.s32.totalorder %v1897_v54, 0 }
 0x294   : > { %v1980_v63 = vmax.f32 %v4221_v11, %v4305_v18 }
 0x296   : > { %v1984_v4 = vmax.f32 %v1980_v63, %v4310_v10 }
 0x298   : > { %v1988_v40 = vmax.f32 %v1984_v4, %v4314_v39 }
 0x29a   : > { %v1672_v11 = vpop.permute.xlu1 %1671 }
 0x29b   : > { %v4319_v55 = vsel %vm1923_vm3, %v4040_v22, %v1672_v11 }
 0x29c   : > { %v1983_v27 = vmax.f32 %v1979_v14, %v4319_v55 }
 0x29e   : > { %v1987_v12 = vmax.f32 %v1983_v27, %v4326_v13 }
 0x2a2   : > { %v1684_v6 = vpop.permute.xlu1 %1683 }
 0x2a3   : > { %v4331_v46 = vsel %vm1926_vm6, %v4067_v24, %v1684_v6 }
 0x2a4   : > { %v1986_v22 = vmax.f32 %v4280_v58, %v4331_v46 }
 0x2a6   : > { %v1990_v32 = vmax.f32 %v1986_v22, %v1987_v12 }
 0x2aa   : > { %v1696_v14 = vpop.permute.xlu1 %1695 }
 0x2ab   : > { %v4336_v23 = vsel %vm1929_vm7, %v4087_v25, %v1696_v14 }
 0x2ac   : > { %v1989_v3 = vmax.f32 %v1985_v9, %v4336_v23 }
 0x2ae   : > { %v1991_v20 = vmax.f32 %v1988_v40, %v1989_v3 }
 0x2b0   : > { %v1992_v15 = vmax.f32 %v1990_v32, %v1991_v20 }
 0x2b2   : > { %v1993_v29 = vrot.slane %v1992_v15, 4 }
 0x2b4   : > { %v1994_v49 = vmax.f32 %v1992_v15, %v1993_v29 }
 0x2b6   : > { %v1995_v34 = vrot.slane %v1994_v49, 2 }
 0x2b8   : > { %v1996_v1 = vmax.f32 %v1994_v49, %v1995_v34 }
 0x2ba   : > { %v1997_v24 = vrot.slane %v1996_v1, 1 }
 0x2bc   : > { %v4339_v51 = vmax.f32 %v1996_v1, %v1997_v24 }
 0x2be   : > { %v1999_v58 = vsub.f32 %v4021_v35, %v4339_v51  ;;  %v2000_v62 = vsub.f32 %v4048_v57, %v4339_v51  ;;  %v2001_v25 = vsub.f32 %v4107_v26, %v4339_v51  ;;  %v2002_v9 = vsub.f32 %v4161_v30, %v4339_v51 }
 0x2bf   : > { %v2003_v63 = vsub.f32 %v4130_v56, %v4339_v51  ;;  %v2004_v48 = vsub.f32 %v4052_v53, %v4339_v51  ;;  %v2005_v21 = vsub.f32 %v4103_v2, %v4339_v51  ;;  %v2006_v35 = vsub.f32 %v4173_v28, %v4339_v51 }
 0x2c0   : > { %v2007_v57 = vsub.f32 %v4140_v17, %v4339_v51  ;;  %v2008_v26 = vsub.f32 %v4058_v37, %v4339_v51  ;;  %v2009_v30 = vsub.f32 %v4202_v43, %v4339_v51  ;;  %v2010_v56 = vsub.f32 %v4182_v19, %v4339_v51 }
 0x2c1   : > { %v2011_v53 = vsub.f32 %v4150_v50, %v4339_v51  ;;  %v2012_v2 = vsub.f32 %v4236_v59, %v4339_v51  ;;  %v2013_v28 = vsub.f32 %v4213_v52, %v4339_v51  ;;  %v2014_v17 = vsub.f32 %v4189_v38, %v4339_v51 }
 0x2c2   : > { %v2015_v37 = vsub.f32 %v4265_v60, %v4339_v51  ;;  %v2016_v43 = vsub.f32 %v4247_v36, %v4339_v51  ;;  %v2017_v19 = vsub.f32 %v4218_v5, %v4339_v51  ;;  %v2018_v50 = vsub.f32 %v4286_v7, %v4339_v51 }
 0x2c3   : > { %v2019_v59 = vsub.f32 %v4273_v8, %v4339_v51  ;;  %v2020_v52 = vsub.f32 %v4256_v42, %v4339_v51  ;;  %v2021_v4 = vsub.f32 %v4305_v18, %v4339_v51  ;;  %v2022_v16 = vsub.f32 %v4293_v44, %v4339_v51 }
 0x2c4   : > { %v2023_v40 = vsub.f32 %v4277_v61, %v4339_v51  ;;  %v2024_v45 = vsub.f32 %v4319_v55, %v4339_v51  ;;  %v2025_v33 = vsub.f32 %v4310_v10, %v4339_v51  ;;  %v2026_v11 = vsub.f32 %v4298_v47, %v4339_v51 }
 0x2c5   : > { %v2027_v0 = vsub.f32 %v4331_v46, %v4339_v51  ;;  %v2028_v27 = vsub.f32 %v4326_v13, %v4339_v51  ;;  %v2029_v31 = vsub.f32 %v4314_v39, %v4339_v51  ;;  %v2030_v12 = vsub.f32 %v4336_v23, %v4339_v51 }
 0x2c6   : > { %v2031_v41 = vmul.f32 1.442695, %v1999_v58  ;;  %v2033_v6 = vmul.f32 1.442695, %v2000_v62  ;;  %v2035_v22 = vmul.f32 1.442695, %v2001_v25 }
 0x2c7   : > { %v2037_v54 = vmul.f32 1.442695, %v2002_v9  ;;  %v2039_v32 = vmul.f32 1.442695, %v2003_v63  ;;  %v2041_v14 = vmul.f32 1.442695, %v2004_v48 }
 0x2c8   : > { %2529 = vpow2.f32 %v2031_v41  ;;  %v2043_v15 = vmul.f32 1.442695, %v2005_v21  ;;  %v2045_v34 = vmul.f32 1.442695, %v2006_v35  ;;  %v2047_v58 = vmul.f32 1.442695, %v2007_v57 }
 0x2c9   : > { %2531 = vpow2.f32 %v2033_v6  ;;  %v2049_v9 = vmul.f32 1.442695, %v2008_v26  ;;  %v2051_v21 = vmul.f32 1.442695, %v2009_v30  ;;  %v2053_v6 = vmul.f32 1.442695, %v2010_v56 }
 0x2ca   : > { %2533 = vpow2.f32 %v2035_v22  ;;  %v2093_v46 = vmul.f32 1.442695, %v2030_v12 }
 0x2cb   : > { %2535 = vpow2.f32 %v2037_v54  ;;  %v2055_v54 = vmul.f32 1.442695, %v2011_v53  ;;  %v2061_v53 = vmul.f32 1.442695, %v2014_v17 }
 0x2cc   : > { %2537 = vpow2.f32 %v2039_v32 }
 0x2cd   : > { %2539 = vpow2.f32 %v2041_v14  ;;  %v2057_v14 = vmul.f32 1.442695, %v2012_v2  ;;  %v2063_v2 = vmul.f32 1.442695, %v2015_v37 }
 0x2ce   : > { %v4405_v3 = vpop.eup %2529  ;;  %2541 = vpow2.f32 %v2043_v15 }
 0x2cf   : > { %v4407_v20 = vpop.eup %2531  ;;  %2543 = vpow2.f32 %v2045_v34 }
 0x2d0   : > { %v2095_v29 = vadd.f32 %v4407_v20, %v4405_v3  ;;  %v4411_v49 = vpop.eup %2533  ;;  %2545 = vpow2.f32 %v2047_v58 }
 0x2d1   : > { %v4414_v24 = vpop.eup %2535  ;;  %2547 = vpow2.f32 %v2049_v9  ;;  %v2065_v9 = vmul.f32 1.442695, %v2016_v43 }
 0x2d2   : > { %v2096_v1 = vadd.f32 %v4411_v49, %v2095_v29  ;;  %v4417_v25 = vpop.eup %2537  ;;  %2549 = vpow2.f32 %v2051_v21  ;;  %v2059_v29 = vmul.f32 1.442695, %v2013_v28  ;;  %v2069_v21 = vmul.f32 1.442695, %v2018_v50 }
 0x2d3   : > { %v4420_v48 = vpop.eup %2539  ;;  %2551 = vpow2.f32 %v2053_v6  ;;  %v2073_v6 = vmul.f32 1.442695, %v2020_v52 }
 0x2d4   : > { %v2097_v62 = vadd.f32 %v4414_v24, %v2096_v1  ;;  %v4423_v41 = vpop.eup %2541  ;;  %2553 = vpow2.f32 %v2055_v54  ;;  %v2077_v54 = vmul.f32 1.442695, %v2022_v16 }
 0x2d5   : > { %v4426_v22 = vpop.eup %2543  ;;  %2555 = vpow2.f32 %v2057_v14  ;;  %v2081_v14 = vmul.f32 1.442695, %v2024_v45 }
 0x2d6   : > { %v2098_v63 = vadd.f32 %v4417_v25, %v2097_v62  ;;  %v4429_v32 = vpop.eup %2545  ;;  %2557 = vpow2.f32 %v2059_v29  ;;  %v2085_v29 = vmul.f32 1.442695, %v2026_v11  ;;  %v2091_v11 = vmul.f32 1.442695, %v2029_v31 }
 0x2d7   : > { %v4432_v15 = vpop.eup %2547  ;;  %2559 = vpow2.f32 %v2061_v53  ;;  %v2089_v53 = vmul.f32 1.442695, %v2028_v27 }
 0x2d8   : > { %v2099_v35 = vadd.f32 %v4420_v48, %v2098_v63  ;;  %v4435_v34 = vpop.eup %2549  ;;  %2561 = vpow2.f32 %v2063_v2  ;;  %v2067_v63 = vmul.f32 1.442695, %v2017_v19 }
 0x2d9   : > { %v4441_v58 = vpop.eup %2551  ;;  %2563 = vpow2.f32 %v2065_v9 }
 0x2da   : > { %v2100_v57 = vadd.f32 %v4423_v41, %v2099_v35  ;;  %v4447_v62 = vpop.eup %2553  ;;  %2565 = vpow2.f32 %v2067_v63  ;;  %v2071_v35 = vmul.f32 1.442695, %v2019_v59 }
 0x2db   : > { %v4453_v17 = vpop.eup %2555  ;;  %2567 = vpow2.f32 %v2069_v21 }
 0x2dc   : > { %v2101_v26 = vadd.f32 %v4426_v22, %v2100_v57  ;;  %v4459_v37 = vpop.eup %2557  ;;  %2569 = vpow2.f32 %v2071_v35  ;;  %v2075_v57 = vmul.f32 1.442695, %v2021_v4 }
 0x2dd   : > { %v4465_v43 = vpop.eup %2559  ;;  %2571 = vpow2.f32 %v2073_v6 }
 0x2de   : > { %v2102_v30 = vadd.f32 %v4429_v32, %v2101_v26  ;;  %v4471_v19 = vpop.eup %2561  ;;  %2573 = vpow2.f32 %v2075_v57  ;;  %v2079_v26 = vmul.f32 1.442695, %v2023_v40 }
 0x2df   : > { %v4477_v50 = vpop.eup %2563  ;;  %2575 = vpow2.f32 %v2077_v54 }
 0x2e0   : > { %v2103_v56 = vadd.f32 %v4432_v15, %v2102_v30  ;;  %v4483_v59 = vpop.eup %2565  ;;  %2577 = vpow2.f32 %v2079_v26  ;;  %v2083_v30 = vmul.f32 1.442695, %v2025_v33 }
 0x2e1   : > { %v4489_v52 = vpop.eup %2567  ;;  %2579 = vpow2.f32 %v2081_v14 }
 0x2e2   : > { %v2104_v1 = vadd.f32 %v4435_v34, %v2103_v56  ;;  %v4495_v4 = vpop.eup %2569  ;;  %2581 = vpow2.f32 %v2083_v30  ;;  %v2087_v56 = vmul.f32 1.442695, %v2027_v0 }
 0x2e3   : > { %v4501_v16 = vpop.eup %2571  ;;  %2583 = vpow2.f32 %v2085_v29 }
 0x2e4   : > { %v2105_v28 = vadd.f32 %v4441_v58, %v2104_v1  ;;  %v4507_v40 = vpop.eup %2573  ;;  %2585 = vpow2.f32 %v2087_v56 }
 0x2e5   : > { %v4513_v45 = vpop.eup %2575  ;;  %2587 = vpow2.f32 %v2089_v53 }
 0x2e6   : > { %v2106_v38 = vadd.f32 %v4447_v62, %v2105_v28  ;;  %v2578_v33 = vpop.eup %2577  ;;  %2589 = vpow2.f32 %v2091_v11 }
 0x2e7   : > { %v2580_v47 = vpop.eup %2579  ;;  %2591 = vpow2.f32 %v2093_v46 }
 0x2e8   : > { %v2107_v60 = vadd.f32 %v4453_v17, %v2106_v38  ;;  %v2582_v28 = vpop.eup %2581 }
 0x2e9   : > { %v2584_v9 = vpop.eup %2583 }
 0x2ea   : > { %v2108_v36 = vadd.f32 %v4459_v37, %v2107_v60  ;;  %v2586_v13 = vpop.eup %2585 }
 0x2eb   : > { %v2588_v63 = vpop.eup %2587 }
 0x2ec   : > { %v2109_v5 = vadd.f32 %v4465_v43, %v2108_v36  ;;  %v2590_v21 = vpop.eup %2589 }
 0x2ed   : > { %v2592_v31 = vpop.eup %2591 }
 0x2ee   : > { %v2110_v7 = vadd.f32 %v4471_v19, %v2109_v5 }
 0x2f0   : > { %v2111_v8 = vadd.f32 %v4477_v50, %v2110_v7 }
 0x2f2   : > { %v2112_v42 = vadd.f32 %v4483_v59, %v2111_v8 }
 0x2f4   : > { %v2113_v18 = vadd.f32 %v4489_v52, %v2112_v42 }
 0x2f6   : > { %v2114_v44 = vadd.f32 %v4495_v4, %v2113_v18 }
 0x2f8   : > { %v2115_v61 = vadd.f32 %v4501_v16, %v2114_v44 }
 0x2fa   : > { %v2116_v55 = vadd.f32 %v4507_v40, %v2115_v61 }
 0x2fc   : > { %v2117_v10 = vadd.f32 %v4513_v45, %v2116_v55 }
 0x2fe   : > { %v2118_v1 = vadd.f32 %v2578_v33, %v2117_v10 }
 0x300   : > { %v2119_v2 = vadd.f32 %v2580_v47, %v2118_v1 }
 0x302   : > { %v2120_v0 = vadd.f32 %v2582_v28, %v2119_v2 }
 0x304   : > { %v2121_v38 = vadd.f32 %v2584_v9, %v2120_v0 }
 0x306   : > { %v2122_v27 = vadd.f32 %v2586_v13, %v2121_v38 }
 0x308   : > { %v2123_v60 = vadd.f32 %v2588_v63, %v2122_v27 }
 0x30a   : > { %v2124_v39 = vadd.f32 %v2590_v21, %v2123_v60 }
 0x30c   : > { %v2125_v36 = vadd.f32 %v2592_v31, %v2124_v39 }
 0x30e   : > { %v2126_v35 = vrot.slane %v2125_v36, 4 }
 0x310   : > { %v2127_v5 = vadd.f32 %v2126_v35, %v2125_v36 }
 0x312   : > { %v2128_v6 = vrot.slane %v2127_v5, 2 }
 0x314   : > { %v2129_v7 = vadd.f32 %v2128_v6, %v2127_v5 }
 0x316   : > { %v2130_v23 = vrot.slane %v2129_v7, 1 }
 0x318   : > { %v2131_v51 = vadd.f32 %v2130_v23, %v2129_v7 }
 0x31a   : > { %2593 = vrcp.f32 %v2131_v51 }
 0x320   : > { %v2594_v12 = vpop.eup %2593 }
 0x321   : > { %v2133_v57 = vmul.f32 %v2594_v12, %v2131_v51 }
 0x323   : > { %v2134_v8 = vsub.f32 2.0, %v2133_v57 }
 0x325   : > { %v2135_v54 = vmul.f32 %v2594_v12, %v2134_v8 }
 0x327   : > { %v2136_v42 = vmul.f32 %v4405_v3, %v2135_v54  ;;  %v2137_v26 = vmul.f32 %v4407_v20, %v2135_v54  ;;  %v2138_v18 = vmul.f32 %v4411_v49, %v2135_v54  ;;  %v2139_v14 = vmul.f32 %v4414_v24, %v2135_v54 }
 0x328   : > { %v2140_v44 = vmul.f32 %v4417_v25, %v2135_v54  ;;  %v2141_v30 = vmul.f32 %v4420_v48, %v2135_v54  ;;  %v2142_v61 = vmul.f32 %v4423_v41, %v2135_v54  ;;  %v2143_v29 = vmul.f32 %v4426_v22, %v2135_v54 }
 0x329   : > { %2168 = vst [vmem:[%s4538_s15] sm:$0xff] %v2136_v42  ;;  %v2144_v3 = vmul.f32 %v4429_v32, %v2135_v54  ;;  %v2145_v20 = vmul.f32 %v4432_v15, %v2135_v54  ;;  %v2150_v49 = vmul.f32 %v4459_v37, %v2135_v54  ;;  %v2151_v24 = vmul.f32 %v4465_v43, %v2135_v54 }
 0x32a   : > { %2169 = vst [vmem:[%s4538_s15 + $0x8] sm:$0xff] %v2137_v26  ;;  %v2152_v25 = vmul.f32 %v4471_v19, %v2135_v54  ;;  %v2153_v48 = vmul.f32 %v4477_v50, %v2135_v54  ;;  %v2154_v41 = vmul.f32 %v4483_v59, %v2135_v54  ;;  %v2155_v22 = vmul.f32 %v4489_v52, %v2135_v54 }
 0x32b   : > { %2170 = vst [vmem:[%s4538_s15 + $0x10] sm:$0xff] %v2138_v18  ;;  %v2156_v32 = vmul.f32 %v4495_v4, %v2135_v54  ;;  %v2157_v15 = vmul.f32 %v4501_v16, %v2135_v54  ;;  %v2158_v37 = vmul.f32 %v4507_v40, %v2135_v54  ;;  %v2159_v43 = vmul.f32 %v4513_v45, %v2135_v54 }
 0x32c   : > { %2171 = vst [vmem:[%s4538_s15 + $0x18] sm:$0xff] %v2139_v14  ;;  %v2160_v19 = vmul.f32 %v2578_v33, %v2135_v54  ;;  %v2161_v50 = vmul.f32 %v2580_v47, %v2135_v54  ;;  %v2162_v59 = vmul.f32 %v2582_v28, %v2135_v54  ;;  %v2163_v52 = vmul.f32 %v2584_v9, %v2135_v54 }
 0x32d   : > { %2172 = vst [vmem:[%s4538_s15 + $0x20] sm:$0xff] %v2140_v44  ;;  %v2164_v4 = vmul.f32 %v2586_v13, %v2135_v54  ;;  %v2165_v55 = vmul.f32 %v2588_v63, %v2135_v54  ;;  %v2166_v16 = vmul.f32 %v2590_v21, %v2135_v54  ;;  %v2167_v40 = vmul.f32 %v2592_v31, %v2135_v54 }
 0x32e   : > { %2173 = vst [vmem:[%s4538_s15 + $0x28] sm:$0xff] %v2141_v30  ;;  %v2146_v45 = vmul.f32 %v4435_v34, %v2135_v54  ;;  %v2147_v56 = vmul.f32 %v4441_v58, %v2135_v54  ;;  %v2148_v10 = vmul.f32 %v4447_v62, %v2135_v54  ;;  %v2149_v33 = vmul.f32 %v4453_v17, %v2135_v54 }
 0x32f   : > { %2174 = vst [vmem:[%s4538_s15 + $0x30] sm:$0xff] %v2142_v61 }
 0x330   : > { %2175 = vst [vmem:[%s4538_s15 + $0x38] sm:$0xff] %v2143_v29  ;;  %v2299_v34 = vld [vmem:[%s4538_s15] sm:$0xff] (%p2737_p5) }
 0x331   : > { %2176 = vst [vmem:[%s4538_s15 + $0x40] sm:$0xff] %v2144_v3  ;;  %v2301_v58 = vld [vmem:[%s4538_s15 + $0x8] sm:$0xff] (%p2737_p5) }
 0x332   : > { %2177 = vst [vmem:[%s4538_s15 + $0x48] sm:$0xff] %v2145_v20  ;;  %v2303_v62 = vld [vmem:[%s4538_s15 + $0x10] sm:$0xff] (%p2737_p5) }
 0x333   : > { %2178 = vst [vmem:[%s4538_s15 + $0x50] sm:$0xff] %v2146_v45  ;;  %v2305_v17 = vld [vmem:[%s4538_s15 + $0x18] sm:$0xff] (%p2737_p5) }
 0x334   : > { %2179 = vst [vmem:[%s4538_s15 + $0x58] sm:$0xff] %v2147_v56  ;;  %v2307_v53 = vld [vmem:[%s4538_s15 + $0x20] sm:$0xff] (%p2737_p5) }
 0x335   : > { %2180 = vst [vmem:[%s4538_s15 + $0x60] sm:$0xff] %v2148_v10  ;;  %v2309_v1 = vld [vmem:[%s4538_s15 + $0x28] sm:$0xff] (%p2737_p5) }
 0x336   : > { %2181 = vst [vmem:[%s4538_s15 + $0x68] sm:$0xff] %v2149_v33  ;;  %v2311_v47 = vld [vmem:[%s4538_s15 + $0x30] sm:$0xff] (%p2737_p5) }
 0x337   : > { %2182 = vst [vmem:[%s4538_s15 + $0x70] sm:$0xff] %v2150_v49  ;;  %v2313_v11 = vld [vmem:[%s4538_s15 + $0x38] sm:$0xff] (%p2737_p5) }
 0x338   : > { %2183 = vst [vmem:[%s4538_s15 + $0x78] sm:$0xff] %v2151_v24  ;;  %v2315_v2 = vld [vmem:[%s4538_s15 + $0x40] sm:$0xff] (%p2737_p5) }
 0x339   : > { %2184 = vst [vmem:[%s4538_s15 + $0x80] sm:$0xff] %v2152_v25  ;;  %v2317_v28 = vld [vmem:[%s4538_s15 + $0x48] sm:$0xff] (%p2737_p5) }
 0x33a   : > { %2185 = vst [vmem:[%s4538_s15 + $0x88] sm:$0xff] %v2153_v48  ;;  %v2319_v46 = vld [vmem:[%s4538_s15 + $0x50] sm:$0xff] (%p2737_p5) }
 0x33b   : > { %2186 = vst [vmem:[%s4538_s15 + $0x90] sm:$0xff] %v2154_v41  ;;  %v2321_v0 = vld [vmem:[%s4538_s15 + $0x58] sm:$0xff] (%p2737_p5) }
 0x33c   : > { %2187 = vst [vmem:[%s4538_s15 + $0x98] sm:$0xff] %v2155_v22  ;;  %v2323_v9 = vld [vmem:[%s4538_s15 + $0x60] sm:$0xff] (%p2737_p5) }
 0x33d   : > { %2188 = vst [vmem:[%s4538_s15 + $0xa0] sm:$0xff] %v2156_v32  ;;  %v2325_v38 = vld [vmem:[%s4538_s15 + $0x68] sm:$0xff] (%p2737_p5) }
 0x33e   : > { %2189 = vst [vmem:[%s4538_s15 + $0xa8] sm:$0xff] %v2157_v15  ;;  %v2327_v13 = vld [vmem:[%s4538_s15 + $0x70] sm:$0xff] (%p2737_p5) }
 0x33f   : > { %2190 = vst [vmem:[%s4538_s15 + $0xb0] sm:$0xff] %v2158_v37  ;;  %v2329_v27 = vld [vmem:[%s4538_s15 + $0x78] sm:$0xff] (%p2737_p5) }
 0x340   : > { %2191 = vst [vmem:[%s4538_s15 + $0xb8] sm:$0xff] %v2159_v43  ;;  %v2331_v63 = vld [vmem:[%s4538_s15 + $0x80] sm:$0xff] (%p2737_p5) }
 0x341   : > { %2192 = vst [vmem:[%s4538_s15 + $0xc0] sm:$0xff] %v2160_v19  ;;  %v2333_v60 = vld [vmem:[%s4538_s15 + $0x88] sm:$0xff] (%p2737_p5) }
 0x342   : > { %2193 = vst [vmem:[%s4538_s15 + $0xc8] sm:$0xff] %v2161_v50  ;;  %v2335_v21 = vld [vmem:[%s4538_s15 + $0x90] sm:$0xff] (%p2737_p5) }
 0x343   : > { %2194 = vst [vmem:[%s4538_s15 + $0xd0] sm:$0xff] %v2162_v59  ;;  %v2337_v39 = vld [vmem:[%s4538_s15 + $0x98] sm:$0xff] (%p2737_p5) }
 0x344   : > { %2195 = vst [vmem:[%s4538_s15 + $0xd8] sm:$0xff] %v2163_v52  ;;  %2206 = sbr.rel (!%p2737_p5) target bundleno = 873 (0x369), region = 82  ;;  %v2339_v31 = vld [vmem:[%s4538_s15 + $0xa0] sm:$0xff] (%p2737_p5) }
 0x345   : > { %2196 = vst [vmem:[%s4538_s15 + $0xe0] sm:$0xff] %v2164_v4  ;;  %v2341_v36 = vld [vmem:[%s4538_s15 + $0xa8] sm:$0xff] (%p2737_p5) }
 0x346   : > { %2197 = vst [vmem:[%s4538_s15 + $0xe8] sm:$0xff] %v2165_v55  ;;  %v2343_v35 = vld [vmem:[%s4538_s15 + $0xb0] sm:$0xff] (%p2737_p5) }
 0x347   : > { %2198 = vst [vmem:[%s4538_s15 + $0xf0] sm:$0xff] %v2166_v16  ;;  %v2345_v5 = vld [vmem:[%s4538_s15 + $0xb8] sm:$0xff] (%p2737_p5) }
 0x348   : > { %2199 = vst [vmem:[%s4538_s15 + $0xf8] sm:$0xff] %v2167_v40  ;;  %v2347_v6 = vld [vmem:[%s4538_s15 + $0xc0] sm:$0xff] (%p2737_p5) }
 0x349   : > { %2300 = vst [vmem:[%s4596_s14] sm:$0xff] %v2299_v34  ;;  %v2349_v7 = vld [vmem:[%s4538_s15 + $0xc8] sm:$0xff] }
 0x34a   : > { %2302 = vst [vmem:[%s4596_s14 + $0x10] sm:$0xff] %v2301_v58  ;;  %v2351_v23 = vld [vmem:[%s4538_s15 + $0xd0] sm:$0xff] }
 0x34b   : > { %2304 = vst [vmem:[%s4596_s14 + $0x20] sm:$0xff] %v2303_v62  ;;  %v2353_v51 = vld [vmem:[%s4538_s15 + $0xd8] sm:$0xff] }
 0x34c   : > { %2306 = vst [vmem:[%s4596_s14 + $0x30] sm:$0xff] %v2305_v17  ;;  %v2355_v12 = vld [vmem:[%s4538_s15 + $0xe0] sm:$0xff] }
 0x34d   : > { %2308 = vst [vmem:[%s4596_s14 + $0x40] sm:$0xff] %v2307_v53  ;;  %v2357_v57 = vld [vmem:[%s4538_s15 + $0xe8] sm:$0xff] }
 0x34e   : > { %2310 = vst [vmem:[%s4596_s14 + $0x50] sm:$0xff] %v2309_v1  ;;  %v2359_v8 = vld [vmem:[%s4538_s15 + $0xf0] sm:$0xff] }
 0x34f   : > { %2312 = vst [vmem:[%s4596_s14 + $0x60] sm:$0xff] %v2311_v47  ;;  %v2361_v54 = vld [vmem:[%s4538_s15 + $0xf8] sm:$0xff] }
 0x350   : > { %2314 = vst [vmem:[%s4596_s14 + $0x70] sm:$0xff] %v2313_v11 }
 0x351   : > { %2316 = vst [vmem:[%s4596_s14 + $0x80] sm:$0xff] %v2315_v2 }
 0x352   : > { %2318 = vst [vmem:[%s4596_s14 + $0x90] sm:$0xff] %v2317_v28 }
 0x353   : > { %2320 = vst [vmem:[%s4596_s14 + $0xa0] sm:$0xff] %v2319_v46 }
 0x354   : > { %2322 = vst [vmem:[%s4596_s14 + $0xb0] sm:$0xff] %v2321_v0 }
 0x355   : > { %2324 = vst [vmem:[%s4596_s14 + $0xc0] sm:$0xff] %v2323_v9 }
 0x356   : > { %2326 = vst [vmem:[%s4596_s14 + $0xd0] sm:$0xff] %v2325_v38 }
 0x357   : > { %2328 = vst [vmem:[%s4596_s14 + $0xe0] sm:$0xff] %v2327_v13 }
 0x358   : > { %2330 = vst [vmem:[%s4596_s14 + $0xf0] sm:$0xff] %v2329_v27 }
 0x359   : > { %2332 = vst [vmem:[%s4596_s14 + $0x100] sm:$0xff] %v2331_v63 }
 0x35a   : > { %2334 = vst [vmem:[%s4596_s14 + $0x110] sm:$0xff] %v2333_v60 }
 0x35b   : > { %2336 = vst [vmem:[%s4596_s14 + $0x120] sm:$0xff] %v2335_v21 }
 0x35c   : > { %2338 = vst [vmem:[%s4596_s14 + $0x130] sm:$0xff] %v2337_v39 }
 0x35d   : > { %2340 = vst [vmem:[%s4596_s14 + $0x140] sm:$0xff] %v2339_v31 }
 0x35e   : > { %2342 = vst [vmem:[%s4596_s14 + $0x150] sm:$0xff] %v2341_v36 }
 0x35f   : > { %2344 = vst [vmem:[%s4596_s14 + $0x160] sm:$0xff] %v2343_v35 }
 0x360   : > { %2346 = vst [vmem:[%s4596_s14 + $0x170] sm:$0xff] %v2345_v5 }
 0x361   : > { %2348 = vst [vmem:[%s4596_s14 + $0x180] sm:$0xff] %v2347_v6 }
 0x362   : > { %2350 = vst [vmem:[%s4596_s14 + $0x190] sm:$0xff] %v2349_v7 }
 0x363   : > { %2352 = vst [vmem:[%s4596_s14 + $0x1a0] sm:$0xff] %v2351_v23 }
 0x364   : > { %2354 = vst [vmem:[%s4596_s14 + $0x1b0] sm:$0xff] %v2353_v51 }
 0x365   : > { %2356 = vst [vmem:[%s4596_s14 + $0x1c0] sm:$0xff] %v2355_v12 }
 0x366   : > { %2358 = vst [vmem:[%s4596_s14 + $0x1d0] sm:$0xff] %v2357_v57 }
 0x367   : > { %2360 = vst [vmem:[%s4596_s14 + $0x1e0] sm:$0xff] %v2359_v8 }
 0x368   : > { %2362 = vst [vmem:[%s4596_s14 + $0x1f0] sm:$0xff] %v2361_v54 }
 0x369 PF: > { %p12_p0 = scmp.ge.s32.totalorder %s2721_s19, 4   ;;  %s4837_s15 = smov %s2664_s16 }
 0x36a   : > { %s4838_s16 = smov %s2731_s22  ;;  %s4839_s17 = smov %s2721_s19 }
 0x36b   :  { %14 = sbr.rel (!%p12_p0) target bundleno = 2 (0x2), region = 155 }
 0x370   :  { %2378 = vsyncpa [#allocation3], 1 }
 0x371   :  { %2380 = vsyncpa [#allocation3 + $0x1], 1 }

</bundles_post_ra>
